<compile_context>
chip_gen: v5e
topology: v5e:2x2
jax: 0.10.0
libtpu: 0.0.40
codegen_flags: <defaults>
</compile_context>

<pallas_src>
import functools

import jax
import jax.numpy as jnp
from jax.experimental import pallas as pl
from jax.experimental.pallas import tpu as pltpu

# ----------------------------------------------------------------------------
# Backbone channel sizes (stand-in for pointnet.Net; head is 128 -> 10 bins).
# ----------------------------------------------------------------------------
C1, C2, C3, CH, COUT = 64, 128, 256, 128, 10
COUT_PAD = 128          # lane-dense padded output width
TN_MAX = 512            # max point-tile size (rows per grid step)
_VMEM_LIMIT = 32 * 1024 * 1024


def _round_up(x, m):
    return ((x + m - 1) // m) * m


def _pick_tile(n):
    n8 = _round_up(n, 8)
    return n8 if n8 <= TN_MAX else TN_MAX


# ----------------------------------------------------------------------------
# Pass 1: backbone.  One (batch, N-tile) per grid step.
# ----------------------------------------------------------------------------
def _backbone_kernel(xin_ref, w1_ref, b1_ref, w2_ref, b2_ref, w34_ref, b3_ref,
                     s1l_ref, tmax_ref, *, n_valid):
    x = xin_ref[0]                                        # (TN, 3+F)  bf16
    tn = x.shape[0]

    # Layer 1: single fused matmul, K = 3+F (rotation already folded in).
    h1 = jnp.dot(x, w1_ref[0], preferred_element_type=jnp.float32) + b1_ref[...]
    h1b = jnp.maximum(h1, 0.0).astype(jnp.bfloat16)       # (TN, C1)

    # Layer 2.
    h2 = jnp.dot(h1b, w2_ref[...], preferred_element_type=jnp.float32) + b2_ref[...]
    h2b = jnp.maximum(h2, 0.0).astype(jnp.bfloat16)       # (TN, C2)

    # Fused w3|w4l matmul: h2b is streamed through the MXU once.
    z = jnp.dot(h2b, w34_ref[...], preferred_element_type=jnp.float32)  # (TN, C3+CH)

    # Layer 3 branch -> per-tile max (padded rows masked to -inf).
    h3 = jnp.maximum(z[:, :C3] + b3_ref[...], 0.0)        # (TN, C3)  f32
    row = (jax.lax.broadcasted_iota(jnp.int32, (tn, 1), 0)
           + pl.program_id(1) * tn)
    h3m = jnp.where(row < n_valid, h3, -jnp.inf)
    tmax_ref[0, 0] = jnp.broadcast_to(
        jnp.max(h3m, axis=0, keepdims=True), (8, C3))     # (8, C3)

    # Local half of the segmentation head (pre-bias, pre-ReLU): h2 @ w4l.
    s1l_ref[0] = z[:, C3:]                                # (TN, CH)  f32


def _backbone_pallas(xin, w1, b1, w2, b2, w34, b3, *, tn, n_valid):
    B, n_pad, k1 = xin.shape
    nt = n_pad // tn
    c1 = w1.shape[-1]
    kernel = functools.partial(_backbone_kernel, n_valid=n_valid)
    return pl.pallas_call(
        kernel,
        out_shape=(
            jax.ShapeDtypeStruct((B, n_pad, CH), jnp.float32),   # s1_local
            jax.ShapeDtypeStruct((B, nt, 8, C3), jnp.float32),   # per-tile max
        ),
        grid=(B, nt),
        in_specs=[
            pl.BlockSpec((1, tn, k1), lambda b, n: (b, n, 0)),   # fused inputs
            pl.BlockSpec((1, k1, c1), lambda b, n: (b, 0, 0)),   # fused layer-1 W
            pl.BlockSpec(b1.shape, lambda b, n: (0, 0)),
            pl.BlockSpec(w2.shape, lambda b, n: (0, 0)),
            pl.BlockSpec(b2.shape, lambda b, n: (0, 0)),
            pl.BlockSpec(w34.shape, lambda b, n: (0, 0)),        # w3 | w4l
            pl.BlockSpec(b3.shape, lambda b, n: (0, 0)),
        ],
        out_specs=(
            pl.BlockSpec((1, tn, CH), lambda b, n: (b, n, 0)),
            pl.BlockSpec((1, 1, 8, C3), lambda b, n: (b, n, 0, 0)),
        ),
        compiler_params=pltpu.CompilerParams(
            dimension_semantics=("parallel", "parallel"),
            vmem_limit_bytes=_VMEM_LIMIT),
    )(xin, w1, b1, w2, b2, w34, b3)


# ----------------------------------------------------------------------------
# Pass 2: segmentation head with lane-dense (128-wide) output.
# ----------------------------------------------------------------------------
def _head_kernel(s1l_ref, gt_ref, w5_ref, b5_ref, out_ref):
    s1 = jnp.maximum(s1l_ref[0] + gt_ref[0], 0.0)         # (TN, CH)  f32
    out_ref[0] = (jnp.dot(s1.astype(jnp.bfloat16), w5_ref[...],
                          preferred_element_type=jnp.float32)
                  + b5_ref[...])                          # (TN, 128) f32


def _head_pallas(s1l, g_term, w5p, b5p, *, tn):
    B, n_pad, ch = s1l.shape
    nt = n_pad // tn
    cp = w5p.shape[-1]
    return pl.pallas_call(
        _head_kernel,
        out_shape=jax.ShapeDtypeStruct((B, n_pad, cp), jnp.float32),
        grid=(B, nt),
        in_specs=[
            pl.BlockSpec((1, tn, ch), lambda b, n: (b, n, 0)),
            pl.BlockSpec((1, 1, ch), lambda b, n: (b, 0, 0)),    # global term
            pl.BlockSpec(w5p.shape, lambda b, n: (0, 0)),
            pl.BlockSpec(b5p.shape, lambda b, n: (0, 0)),
        ],
        out_specs=pl.BlockSpec((1, tn, cp), lambda b, n: (b, n, 0)),
        compiler_params=pltpu.CompilerParams(
            dimension_semantics=("parallel", "parallel"),
            vmem_limit_bytes=_VMEM_LIMIT),
    )(s1l, g_term, w5p, b5p)


# ----------------------------------------------------------------------------
# Plain-JAX glue: normalizing frame (rotation + center, tiny per-batch math).
# ----------------------------------------------------------------------------
def _normalize(v, eps=1e-12):
    n = jnp.linalg.norm(v, axis=-1, keepdims=True)
    return v / jnp.maximum(n, eps)


def _random_rotations(n, key):
    # pytorch3d.transforms.random_rotations: random unit quaternion -> matrix.
    q = jax.random.normal(key, (n, 4), dtype=jnp.float32)
    q = q / jnp.linalg.norm(q, axis=-1, keepdims=True)
    r, i, j, k = q[:, 0], q[:, 1], q[:, 2], q[:, 3]
    two_s = 2.0 / jnp.sum(q * q, axis=-1)
    o = jnp.stack([
        1 - two_s * (j * j + k * k), two_s * (i * j - k * r), two_s * (i * k + j * r),
        two_s * (i * j + k * r), 1 - two_s * (i * i + k * k), two_s * (j * k - i * r),
        two_s * (i * k - j * r), two_s * (j * k + i * r), 1 - two_s * (i * i + j * j),
    ], axis=-1)
    return o.reshape(n, 3, 3)


def get_normalizing_rotation(hand_verts, obj_verts, key):
    """Rotation M (columns x,y,z) and center c such that the reference's
    normalized vertices equal (v - c) @ M  (analytic rigid inverse)."""
    obj_centroid = jnp.mean(obj_verts, axis=1)            # (B, 3)
    hand_centroid = jnp.mean(hand_verts, axis=1)
    x_vec = _normalize(hand_centroid - obj_centroid)
    rand = _random_rotations(hand_verts.shape[0], key)
    # Degenerate-frame guard: if rand column 0 is ~parallel to x_vec, fall
    # back to column 1 (orthogonal to column 0, cannot also be parallel).
    c0 = jnp.cross(x_vec, rand[:, :, 0])
    c1 = jnp.cross(x_vec, rand[:, :, 1])
    n0 = jnp.linalg.norm(c0, axis=-1, keepdims=True)
    y_vec = _normalize(jnp.where(n0 > 1e-6, c0, c1))
    z_vec = _normalize(jnp.cross(x_vec, y_vec))
    M = jnp.stack([x_vec, y_vec, z_vec], axis=-1)         # (B, 3, 3)
    return M, obj_centroid


# ----------------------------------------------------------------------------
# Parameter initialization (deterministic, synthetic, f32 "trained" weights).
# ----------------------------------------------------------------------------
def init_params(feat_dim, key):
    def dense(key, fan_in, fan_out):
        scale = 1.0 / jnp.sqrt(jnp.float32(fan_in))
        return scale * jax.random.normal(key, (fan_in, fan_out), jnp.float32)

    ks = jax.random.split(key, 8)
    return {
        "w1p": dense(ks[0], 3, C1),
        "w1f": dense(ks[1], feat_dim, C1),
        "b1": jnp.zeros((1, C1), jnp.float32),
        "w2": dense(ks[2], C1, C2),
        "b2": jnp.zeros((1, C2), jnp.float32),
        "w3": dense(ks[3], C2, C3),
        "b3": jnp.zeros((1, C3), jnp.float32),
        "w4l": dense(ks[4], C2, CH),
        "w4g": dense(ks[5], C3, CH),
        "b4": jnp.zeros((1, CH), jnp.float32),
        "w5": dense(ks[6], CH, COUT),
        "b5": jnp.zeros((1, COUT), jnp.float32),
    }


# ----------------------------------------------------------------------------
# DeepContactNet.forward
# ----------------------------------------------------------------------------
@functools.partial(jax.jit, static_argnames=("normalize_pts",))
def deep_contact_net_forward(hand_verts, hand_feats, obj_verts, obj_feats,
                             params, rot_key, normalize_pts=True):
    B, Nh, _ = hand_verts.shape
    No = obj_verts.shape[1]
    N = Nh + No
    Fdim = hand_feats.shape[-1]
    bf16 = jnp.bfloat16

    # verts_to_pointcloud (padded -> packed): concat along the point axis;
    # the per-batch index vector is implicit in the kernel grid.
    pos = jnp.concatenate([hand_verts, obj_verts], axis=1).astype(jnp.float32)
    feats = jnp.concatenate([hand_feats, obj_feats], axis=1).astype(jnp.float32)

    if normalize_pts:
        M, center = get_normalizing_rotation(
            hand_verts.astype(jnp.float32), obj_verts.astype(jnp.float32), rot_key)
    else:
        M = jnp.broadcast_to(jnp.eye(3, dtype=jnp.float32), (B, 3, 3))
        center = jnp.zeros((B, 3), jnp.float32)

    # Center in f32 BEFORE the bf16 cast; fold only the rotation into layer 1:
    #   ((v - c) @ M) @ w1p == (v - c) @ (M @ w1p)
    pos_c = pos - center[:, None, :]
    w1p_rot = jnp.einsum("bij,jk->bik", M, params["w1p"])            # (B,3,C1)
    w1f_b = jnp.broadcast_to(params["w1f"][None], (B, Fdim, C1))
    w1_fused = jnp.concatenate([w1p_rot, w1f_b], axis=1).astype(bf16)  # (B,3+F,C1)

    # Single fused layer-1 input stream: one matmul with K = 3+F.
    xin = jnp.concatenate([pos_c, feats], axis=-1).astype(bf16)      # (B,N,3+F)

    tn = _pick_tile(N)
    n_pad = _round_up(N, tn)
    if n_pad != N:
        xin = jnp.pad(xin, ((0, 0), (0, n_pad - N), (0, 0)))

    # Fused w3 | w4l weight (shared LHS h2 streamed through the MXU once).
    w34 = jnp.concatenate([params["w3"], params["w4l"]], axis=1).astype(bf16)

    s1_local, tile_max = _backbone_pallas(
        xin, w1_fused, params["b1"], params["w2"].astype(bf16), params["b2"],
        w34, params["b3"], tn=tn, n_valid=N)

    # Cross-tile global max pool + global branch of the head (per-batch, tiny).
    g = jnp.max(tile_max, axis=(1, 2))                               # (B, C3)
    g_term = (jnp.einsum("bc,ch->bh", g, params["w4g"])
              + params["b4"])[:, None, :]                            # (B,1,CH)

    # Zero-pad w5/b5 to 128 lanes so the kernel's stores are lane-dense.
    w5p = jnp.pad(params["w5"], ((0, 0), (0, COUT_PAD - COUT))).astype(bf16)
    b5p = jnp.pad(params["b5"], ((0, 0), (0, COUT_PAD - COUT)))

    contact_full = _head_pallas(s1_local, g_term, w5p, b5p, tn=tn)   # (B,n_pad,128)
    contact = contact_full[:, :N, :COUT]

    return {
        "contact_hand": contact[:, :Nh, :],
        "contact_obj": contact[:, Nh:, :],
    }


# ----------------------------------------------------------------------------
# Demo
# ----------------------------------------------------------------------------
if __name__ == "__main__":
    key = jax.random.PRNGKey(0)
    k_hv, k_hf, k_ov, k_of, k_par, k_rot = jax.random.split(key, 6)

    # Small shapes consistent with the real module (real: 778 hand verts,
    # 2048 obj verts, 25-dim per-vertex features).
    B, Nh, No, Fdim = 2, 64, 128, 8
    hand_verts = jax.random.normal(k_hv, (B, Nh, 3), jnp.float32)
    hand_feats = jax.random.normal(k_hf, (B, Nh, Fdim), jnp.float32)
    obj_verts = jax.random.normal(k_ov, (B, No, 3), jnp.float32)
    obj_feats = jax.random.normal(k_of, (B, No, Fdim), jnp.float32)

    params = init_params(Fdim, k_par)

    out = deep_contact_net_forward(hand_verts, hand_feats, obj_verts,
                                   obj_feats, params, k_rot)
    jax.block_until_ready(out)

    assert out["contact_hand"].shape == (B, Nh, COUT)
    assert out["contact_obj"].shape == (B, No, COUT)
    assert out["contact_hand"].dtype == jnp.float32
    print("KERNEL_OK")
</pallas_src>

<mosaic_0001>
module attributes {stable_mosaic.version = 11 : i64} {
  func.func @_backbone_kernel(%arg0: i32, %arg1: i32, %arg2: memref<1x192x11xbf16, #tpu.memory_space<vmem>>, %arg3: memref<1x11x64xbf16, #tpu.memory_space<vmem>>, %arg4: memref<1x64xf32, #tpu.memory_space<vmem>>, %arg5: memref<64x128xbf16, #tpu.memory_space<vmem>>, %arg6: memref<1x128xf32, #tpu.memory_space<vmem>>, %arg7: memref<128x384xbf16, #tpu.memory_space<vmem>>, %arg8: memref<1x256xf32, #tpu.memory_space<vmem>>, %arg9: memref<1x192x128xf32, #tpu.memory_space<vmem>>, %arg10: memref<1x1x8x256xf32, #tpu.memory_space<vmem>>) attributes {dimension_semantics = [#tpu.dimension_semantics<parallel>, #tpu.dimension_semantics<parallel>], iteration_bounds = array<i64: 2, 1>, scalar_prefetch = 0 : i64, scratch_operands = 0 : i64, tpu.core_type = #tpu.core_type<tc>, window_params = [{transform_indices = @transform_0, window_bounds = array<i64: 1, 192, 11>}, {transform_indices = @transform_1, window_bounds = array<i64: 1, 11, 64>}, {pipeline_mode = #tpu.pipeline_mode<synchronous>, transform_indices = @transform_2, window_bounds = array<i64: 1, 64>}, {pipeline_mode = #tpu.pipeline_mode<synchronous>, transform_indices = @transform_3, window_bounds = array<i64: 64, 128>}, {pipeline_mode = #tpu.pipeline_mode<synchronous>, transform_indices = @transform_4, window_bounds = array<i64: 1, 128>}, {pipeline_mode = #tpu.pipeline_mode<synchronous>, transform_indices = @transform_5, window_bounds = array<i64: 128, 384>}, {pipeline_mode = #tpu.pipeline_mode<synchronous>, transform_indices = @transform_6, window_bounds = array<i64: 1, 256>}, {transform_indices = @transform_7, window_bounds = array<i64: 1, 192, 128>}, {transform_indices = @transform_8, window_bounds = array<i64: 1, 1, 8, 256>}]} {
    %c0 = arith.constant 0 : index
    %c0_0 = arith.constant 0 : index
    %c0_1 = arith.constant 0 : index
    %0 = vector.load %arg2[%c0, %c0_0, %c0_1] : memref<1x192x11xbf16, #tpu.memory_space<vmem>>, vector<1x192x11xbf16>
    %1 = vector.shape_cast %0 : vector<1x192x11xbf16> to vector<192x11xbf16>
    %c0_2 = arith.constant 0 : index
    %c0_3 = arith.constant 0 : index
    %c0_4 = arith.constant 0 : index
    %2 = vector.load %arg3[%c0_2, %c0_3, %c0_4] : memref<1x11x64xbf16, #tpu.memory_space<vmem>>, vector<1x11x64xbf16>
    %3 = vector.shape_cast %2 : vector<1x11x64xbf16> to vector<11x64xbf16>
    %cst = arith.constant dense<0.000000e+00> : vector<192x64xf32>
    %4 = tpu.matmul %1, %3, %cst {dimension_numbers = #tpu.dot_dimension_numbers<[1], [0], [0], [1], [0, 0, 1, 1], [], []>} : vector<192x11xbf16>, vector<11x64xbf16>, vector<192x64xf32> -> vector<192x64xf32>
    %c0_5 = arith.constant 0 : index
    %c0_6 = arith.constant 0 : index
    %5 = vector.load %arg4[%c0_5, %c0_6] : memref<1x64xf32, #tpu.memory_space<vmem>>, vector<1x64xf32>
    %6 = vector.broadcast %5 : vector<1x64xf32> to vector<192x64xf32>
    %7 = arith.addf %4, %6 : vector<192x64xf32>
    %cst_7 = arith.constant 0.000000e+00 : f32
    %8 = vector.broadcast %cst_7 : f32 to vector<192x64xf32>
    %9 = arith.maximumf %7, %8 : vector<192x64xf32>
    %10 = arith.truncf %9 : vector<192x64xf32> to vector<192x64xbf16>
    %c0_8 = arith.constant 0 : index
    %c0_9 = arith.constant 0 : index
    %11 = vector.load %arg5[%c0_8, %c0_9] : memref<64x128xbf16, #tpu.memory_space<vmem>>, vector<64x128xbf16>
    %cst_10 = arith.constant dense<0.000000e+00> : vector<192x128xf32>
    %12 = tpu.matmul %10, %11, %cst_10 {dimension_numbers = #tpu.dot_dimension_numbers<[1], [0], [0], [1], [0, 0, 1, 1], [], []>} : vector<192x64xbf16>, vector<64x128xbf16>, vector<192x128xf32> -> vector<192x128xf32>
    %c0_11 = arith.constant 0 : index
    %c0_12 = arith.constant 0 : index
    %13 = vector.load %arg6[%c0_11, %c0_12] : memref<1x128xf32, #tpu.memory_space<vmem>>, vector<1x128xf32>
    %14 = vector.broadcast %13 : vector<1x128xf32> to vector<192x128xf32>
    %15 = arith.addf %12, %14 : vector<192x128xf32>
    %cst_13 = arith.constant 0.000000e+00 : f32
    %16 = vector.broadcast %cst_13 : f32 to vector<192x128xf32>
    %17 = arith.maximumf %15, %16 : vector<192x128xf32>
    %18 = arith.truncf %17 : vector<192x128xf32> to vector<192x128xbf16>
    %c0_14 = arith.constant 0 : index
    %c0_15 = arith.constant 0 : index
    %19 = vector.load %arg7[%c0_14, %c0_15] : memref<128x384xbf16, #tpu.memory_space<vmem>>, vector<128x384xbf16>
    %cst_16 = arith.constant dense<0.000000e+00> : vector<192x384xf32>
    %20 = tpu.matmul %18, %19, %cst_16 {dimension_numbers = #tpu.dot_dimension_numbers<[1], [0], [0], [1], [0, 0, 1, 1], [], []>} : vector<192x128xbf16>, vector<128x384xbf16>, vector<192x384xf32> -> vector<192x384xf32>
    %21 = vector.extract_strided_slice %20 {offsets = [0, 0], sizes = [192, 256], strides = [1, 1]} : vector<192x384xf32> to vector<192x256xf32>
    %c0_17 = arith.constant 0 : index
    %c0_18 = arith.constant 0 : index
    %22 = vector.load %arg8[%c0_17, %c0_18] : memref<1x256xf32, #tpu.memory_space<vmem>>, vector<1x256xf32>
    %23 = vector.broadcast %22 : vector<1x256xf32> to vector<192x256xf32>
    %24 = arith.addf %21, %23 : vector<192x256xf32>
    %cst_19 = arith.constant 0.000000e+00 : f32
    %25 = vector.broadcast %cst_19 : f32 to vector<192x256xf32>
    %26 = arith.maximumf %24, %25 : vector<192x256xf32>
    %27 = tpu.iota {dimensions = array<i32: 0>} : vector<192x1xi32>
    %c192_i32 = arith.constant 192 : i32
    %28 = arith.muli %arg1, %c192_i32 : i32
    %29 = vector.broadcast %28 : i32 to vector<192x1xi32>
    %30 = arith.addi %27, %29 : vector<192x1xi32>
    %c192_i32_20 = arith.constant 192 : i32
    %31 = vector.broadcast %c192_i32_20 : i32 to vector<192x1xi32>
    %32 = arith.cmpi slt, %30, %31 : vector<192x1xi32>
    %cst_21 = arith.constant 0xFF800000 : f32
    %33 = vector.shape_cast %32 : vector<192x1xi1> to vector<192x1xi1>
    %34 = vector.broadcast %33 : vector<192x1xi1> to vector<192x256xi1>
    %35 = vector.broadcast %cst_21 : f32 to vector<192x256xf32>
    %36 = arith.select %34, %26, %35 : vector<192x256xi1>, vector<192x256xf32>
    %cst_22 = arith.constant dense<0xFF800000> : vector<256xf32>
    %37 = vector.multi_reduction <maximumf>, %36, %cst_22 [0] : vector<192x256xf32> to vector<256xf32>
    %38 = vector.shape_cast %37 : vector<256xf32> to vector<1x256xf32>
    %39 = vector.shape_cast %38 : vector<1x256xf32> to vector<1x256xf32>
    %40 = vector.broadcast %39 : vector<1x256xf32> to vector<8x256xf32>
    %c0_23 = arith.constant 0 : index
    %c0_24 = arith.constant 0 : index
    %c0_25 = arith.constant 0 : index
    %c0_26 = arith.constant 0 : index
    %41 = vector.load %arg10[%c0_23, %c0_24, %c0_25, %c0_26] : memref<1x1x8x256xf32, #tpu.memory_space<vmem>>, vector<1x1x8x256xf32>
    %42 = vector.shape_cast %41 : vector<1x1x8x256xf32> to vector<8x256xf32>
    %43 = vector.shape_cast %40 : vector<8x256xf32> to vector<1x1x8x256xf32>
    tpu.vector_store %arg10[%c0_23, %c0_24, %c0_25, %c0_26], %43 {strides = array<i32>} : memref<1x1x8x256xf32, #tpu.memory_space<vmem>>, vector<1x1x8x256xf32>,
    %44 = vector.extract_strided_slice %20 {offsets = [0, 256], sizes = [192, 128], strides = [1, 1]} : vector<192x384xf32> to vector<192x128xf32>
    %c0_27 = arith.constant 0 : index
    %c0_28 = arith.constant 0 : index
    %c0_29 = arith.constant 0 : index
    %45 = vector.load %arg9[%c0_27, %c0_28, %c0_29] : memref<1x192x128xf32, #tpu.memory_space<vmem>>, vector<1x192x128xf32>
    %46 = vector.shape_cast %45 : vector<1x192x128xf32> to vector<192x128xf32>
    %47 = vector.shape_cast %44 : vector<192x128xf32> to vector<1x192x128xf32>
    tpu.vector_store %arg9[%c0_27, %c0_28, %c0_29], %47 {strides = array<i32>} : memref<1x192x128xf32, #tpu.memory_space<vmem>>, vector<1x192x128xf32>,
    return
  }
  func.func @transform_0(%arg0: i32, %arg1: i32) -> (i32, i32, i32) {
    %c0_i32 = arith.constant 0 : i32
    %c0_i32_0 = arith.constant 0 : i32
    return %arg0, %arg1, %c0_i32 : i32, i32, i32
  }
  func.func @transform_1(%arg0: i32, %arg1: i32) -> (i32, i32, i32) {
    %c0_i32 = arith.constant 0 : i32
    %c0_i32_0 = arith.constant 0 : i32
    %c0_i32_1 = arith.constant 0 : i32
    return %arg0, %c0_i32, %c0_i32_0 : i32, i32, i32
  }
  func.func @transform_2(%arg0: i32, %arg1: i32) -> (i32, i32) {
    %c0_i32 = arith.constant 0 : i32
    %c0_i32_0 = arith.constant 0 : i32
    %c0_i32_1 = arith.constant 0 : i32
    return %c0_i32, %c0_i32_0 : i32, i32
  }
  func.func @transform_3(%arg0: i32, %arg1: i32) -> (i32, i32) {
    %c0_i32 = arith.constant 0 : i32
    %c0_i32_0 = arith.constant 0 : i32
    %c0_i32_1 = arith.constant 0 : i32
    return %c0_i32, %c0_i32_0 : i32, i32
  }
  func.func @transform_4(%arg0: i32, %arg1: i32) -> (i32, i32) {
    %c0_i32 = arith.constant 0 : i32
    %c0_i32_0 = arith.constant 0 : i32
    %c0_i32_1 = arith.constant 0 : i32
    return %c0_i32, %c0_i32_0 : i32, i32
  }
  func.func @transform_5(%arg0: i32, %arg1: i32) -> (i32, i32) {
    %c0_i32 = arith.constant 0 : i32
    %c0_i32_0 = arith.constant 0 : i32
    %c0_i32_1 = arith.constant 0 : i32
    return %c0_i32, %c0_i32_0 : i32, i32
  }
  func.func @transform_6(%arg0: i32, %arg1: i32) -> (i32, i32) {
    %c0_i32 = arith.constant 0 : i32
    %c0_i32_0 = arith.constant 0 : i32
    %c0_i32_1 = arith.constant 0 : i32
    return %c0_i32, %c0_i32_0 : i32, i32
  }
  func.func @transform_7(%arg0: i32, %arg1: i32) -> (i32, i32, i32) {
    %c0_i32 = arith.constant 0 : i32
    %c0_i32_0 = arith.constant 0 : i32
    return %arg0, %arg1, %c0_i32 : i32, i32, i32
  }
  func.func @transform_8(%arg0: i32, %arg1: i32) -> (i32, i32, i32, i32) {
    %c0_i32 = arith.constant 0 : i32
    %c0_i32_0 = arith.constant 0 : i32
    %c0_i32_1 = arith.constant 0 : i32
    return %arg0, %arg1, %c0_i32, %c0_i32_0 : i32, i32, i32, i32
  }
}

module attributes {stable_mosaic.version = 11 : i64} {
  func.func @_head_kernel(%arg0: i32, %arg1: i32, %arg2: memref<1x192x128xf32, #tpu.memory_space<vmem>>, %arg3: memref<1x1x128xf32, #tpu.memory_space<vmem>>, %arg4: memref<128x128xbf16, #tpu.memory_space<vmem>>, %arg5: memref<1x128xf32, #tpu.memory_space<vmem>>, %arg6: memref<1x192x128xf32, #tpu.memory_space<vmem>>) attributes {dimension_semantics = [#tpu.dimension_semantics<parallel>, #tpu.dimension_semantics<parallel>], iteration_bounds = array<i64: 2, 1>, scalar_prefetch = 0 : i64, scratch_operands = 0 : i64, tpu.core_type = #tpu.core_type<tc>, window_params = [{transform_indices = @transform_0, window_bounds = array<i64: 1, 192, 128>}, {transform_indices = @transform_1, window_bounds = array<i64: 1, 1, 128>}, {pipeline_mode = #tpu.pipeline_mode<synchronous>, transform_indices = @transform_2, window_bounds = array<i64: 128, 128>}, {pipeline_mode = #tpu.pipeline_mode<synchronous>, transform_indices = @transform_3, window_bounds = array<i64: 1, 128>}, {transform_indices = @transform_4, window_bounds = array<i64: 1, 192, 128>}]} {
    %c0 = arith.constant 0 : index
    %c0_0 = arith.constant 0 : index
    %c0_1 = arith.constant 0 : index
    %0 = vector.load %arg2[%c0, %c0_0, %c0_1] : memref<1x192x128xf32, #tpu.memory_space<vmem>>, vector<1x192x128xf32>
    %1 = vector.shape_cast %0 : vector<1x192x128xf32> to vector<192x128xf32>
    %c0_2 = arith.constant 0 : index
    %c0_3 = arith.constant 0 : index
    %c0_4 = arith.constant 0 : index
    %2 = vector.load %arg3[%c0_2, %c0_3, %c0_4] : memref<1x1x128xf32, #tpu.memory_space<vmem>>, vector<1x1x128xf32>
    %3 = vector.shape_cast %2 : vector<1x1x128xf32> to vector<1x128xf32>
    %4 = vector.broadcast %3 : vector<1x128xf32> to vector<192x128xf32>
    %5 = arith.addf %1, %4 : vector<192x128xf32>
    %cst = arith.constant 0.000000e+00 : f32
    %6 = vector.broadcast %cst : f32 to vector<192x128xf32>
    %7 = arith.maximumf %5, %6 : vector<192x128xf32>
    %8 = arith.truncf %7 : vector<192x128xf32> to vector<192x128xbf16>
    %c0_5 = arith.constant 0 : index
    %c0_6 = arith.constant 0 : index
    %9 = vector.load %arg4[%c0_5, %c0_6] : memref<128x128xbf16, #tpu.memory_space<vmem>>, vector<128x128xbf16>
    %cst_7 = arith.constant dense<0.000000e+00> : vector<192x128xf32>
    %10 = tpu.matmul %8, %9, %cst_7 {dimension_numbers = #tpu.dot_dimension_numbers<[1], [0], [0], [1], [0, 0, 1, 1], [], []>} : vector<192x128xbf16>, vector<128x128xbf16>, vector<192x128xf32> -> vector<192x128xf32>
    %c0_8 = arith.constant 0 : index
    %c0_9 = arith.constant 0 : index
    %11 = vector.load %arg5[%c0_8, %c0_9] : memref<1x128xf32, #tpu.memory_space<vmem>>, vector<1x128xf32>
    %12 = vector.broadcast %11 : vector<1x128xf32> to vector<192x128xf32>
    %13 = arith.addf %10, %12 : vector<192x128xf32>
    %c0_10 = arith.constant 0 : index
    %c0_11 = arith.constant 0 : index
    %c0_12 = arith.constant 0 : index
    %14 = vector.load %arg6[%c0_10, %c0_11, %c0_12] : memref<1x192x128xf32, #tpu.memory_space<vmem>>, vector<1x192x128xf32>
    %15 = vector.shape_cast %14 : vector<1x192x128xf32> to vector<192x128xf32>
    %16 = vector.shape_cast %13 : vector<192x128xf32> to vector<1x192x128xf32>
    tpu.vector_store %arg6[%c0_10, %c0_11, %c0_12], %16 {strides = array<i32>} : memref<1x192x128xf32, #tpu.memory_space<vmem>>, vector<1x192x128xf32>,
    return
  }
  func.func @transform_0(%arg0: i32, %arg1: i32) -> (i32, i32, i32) {
    %c0_i32 = arith.constant 0 : i32
    %c0_i32_0 = arith.constant 0 : i32
    return %arg0, %arg1, %c0_i32 : i32, i32, i32
  }
  func.func @transform_1(%arg0: i32, %arg1: i32) -> (i32, i32, i32) {
    %c0_i32 = arith.constant 0 : i32
    %c0_i32_0 = arith.constant 0 : i32
    %c0_i32_1 = arith.constant 0 : i32
    return %arg0, %c0_i32, %c0_i32_0 : i32, i32, i32
  }
  func.func @transform_2(%arg0: i32, %arg1: i32) -> (i32, i32) {
    %c0_i32 = arith.constant 0 : i32
    %c0_i32_0 = arith.constant 0 : i32
    %c0_i32_1 = arith.constant 0 : i32
    return %c0_i32, %c0_i32_0 : i32, i32
  }
  func.func @transform_3(%arg0: i32, %arg1: i32) -> (i32, i32) {
    %c0_i32 = arith.constant 0 : i32
    %c0_i32_0 = arith.constant 0 : i32
    %c0_i32_1 = arith.constant 0 : i32
    return %c0_i32, %c0_i32_0 : i32, i32
  }
  func.func @transform_4(%arg0: i32, %arg1: i32) -> (i32, i32, i32) {
    %c0_i32 = arith.constant 0 : i32
    %c0_i32_0 = arith.constant 0 : i32
    return %arg0, %arg1, %c0_i32 : i32, i32, i32
  }
}

</mosaic_0001>

<bundles_post_ra>
// kernel: deep_contact_net_forward.3
= control target key start
LH: loop header
LB: loop body
LE: loop exit
PB: predicated region body
PF: predicated region fallthrough
CT: control target
= control target key end

     0   :  { %s745_s15 = smov 0   ;;  %s747_s16 = smov 0   ;;  %s920_s0 = inlined_call_operand.vmem [shape: f32[2,192,128], index: 0, kind: input, shape index: {}]   ;;  %s921_s1 = inlined_call_operand.vmem [shape: f32[2,1,128], index: 1, kind: input, shape index: {}]   ;;  %s922_s2 = inlined_call_operand.vmem [shape: bf16[128,128], index: 2, kind: input, shape index: {}]   ;;  %s923_s3 = inlined_call_operand.vmem [shape: f32[1,128], index: 3, kind: input, shape index: {}]   ;;  %s924_s4 = inlined_call_operand.vmem [shape: f32[2,192,128], index: 4, kind: output, shape index: {}]  }
   0x1   :  { %s749_s17 = smov 0  }
   0x2 LB: > { %s26_s18 = sadd.s32 1, %s714_s16  ;;  %p600_p0 = scmp.ge.s32.totalorder %s718_s17, 1  ;;  %s718_s17 = sphi %s749_s17, %s14_s17   ;;  %s714_s16 = sphi %s747_s16, %s926_s16   ;;  %s710_s15 = sphi %s745_s15, %s925_s15  }
   0x3   : > { %p28_p1 = scmp.ge.s32.totalorder %s26_s18, 2  ;;  %p191_p2 = scmp.lt.s32.totalorder %s718_s17, 3 }
   0x5   : > { %s928_s18 = smov (%p28_p1, %s26_s18), 0  ;;  %p192_p3 = pnand %p600_p0, %p191_p2 }
   0x6   : > { %p229_p4 = scmp.lt.s32.totalorder (!%p192_p3), %s710_s15, 1 }
   0x7   : > { %195 = sbr.rel (%p192_p3) target bundleno = 221 (0xdd), region = 36 }
   0xc   : > { %v644_v0 = vld [vmem:[%s922_s2 + $0x38] sm:$0xff]  ;;  %v643_v1 = vld [vmem:[%s922_s2 + $0x30] sm:$0xff]  ;;  %s930_s15 = smov (!%p229_p4, %s710_s15), 1  ;;  %v642_v2 = vld [vmem:[%s922_s2 + $0x28] sm:$0xff] }
   0xd   : > { %407 = vmatpush.bf16.msra.mxu0 %v644_v0  ;;  %645 = vmatpush.bf16.msra.mxu1 %v644_v0  ;;  %s240_s25 = scalar_lea.vmem %s921_s1, %s930_s15  ;;  %v641_v3 = vld [vmem:[%s922_s2 + $0x20] sm:$0xff]  ;;  %s669_s30 = smul.u32 192, %s930_s15  ;;  %v640_v4 = vld [vmem:[%s922_s2 + $0x18] sm:$0xff]  ;;  %v639_v6 = vld [vmem:[%s922_s2 + $0x10] sm:$0xff] }
   0xe   : > { %646 = vmatpush.bf16.msra.mxu2 %v644_v0  ;;  %647 = vmatpush.bf16.msra.mxu3 %v644_v0  ;;  %v792_v5 = vld [vmem:[%s240_s25] ss:$0 sm:$0xff]  ;;  %v638_v20 = vld [vmem:[%s922_s2 + $0x8] sm:$0xff] }
   0xf   : > { %s790_s9 = scalar_lea.vmem %s920_s0, %s669_s30  ;;  %v637_v28 = vld [vmem:[%s922_s2] sm:$0xff]  ;;  %s861_s24 = scalar_lea.vmem %s924_s4, %s669_s30 }
  0x10   : > { %v251_v7 = vld [vmem:[%s790_s9] sm:$0xff]  ;;  %v252_v8 = vld [vmem:[%s790_s9 + $0x8] sm:$0xff]  ;;  %v257_v9 = vld [vmem:[%s790_s9 + $0x30] sm:$0xff] }
  0x11   : > { %408 = vmatpush.bf16.msra.mxu0 %v643_v1  ;;  %648 = vmatpush.bf16.msra.mxu1 %v643_v1  ;;  %v258_v10 = vld [vmem:[%s790_s9 + $0x38] sm:$0xff]  ;;  %v263_v11 = vld [vmem:[%s790_s9 + $0x60] sm:$0xff]  ;;  %v264_v12 = vld [vmem:[%s790_s9 + $0x68] sm:$0xff]  ;;  %v279_v15 = vadd.f32 %v792_v5, %v251_v7  ;;  %v280_v16 = vadd.f32 %v792_v5, %v252_v8  ;;  %v285_v17 = vadd.f32 %v792_v5, %v257_v9 }
  0x12   : > { %649 = vmatpush.bf16.msra.mxu2 %v643_v1  ;;  %650 = vmatpush.bf16.msra.mxu3 %v643_v1  ;;  %v269_v13 = vld [vmem:[%s790_s9 + $0x90] sm:$0xff]  ;;  %v270_v14 = vld [vmem:[%s790_s9 + $0x98] sm:$0xff]  ;;  %v286_v18 = vadd.f32 %v792_v5, %v258_v10  ;;  %v291_v19 = vadd.f32 %v792_v5, %v263_v11  ;;  %v292_v21 = vadd.f32 %v792_v5, %v264_v12  ;;  %v259_v39 = vld [vmem:[%s790_s9 + $0x40] sm:$0xff] }
  0x13   : > { %v297_v22 = vadd.f32 %v792_v5, %v269_v13  ;;  %v298_v23 = vadd.f32 %v792_v5, %v270_v14  ;;  %v303_v24 = vmax.f32 %v279_v15, 0.0  ;;  %v304_v25 = vmax.f32 %v280_v16, 0.0  ;;  %v253_v37 = vld [vmem:[%s790_s9 + $0x10] sm:$0xff]  ;;  %v254_v38 = vld [vmem:[%s790_s9 + $0x18] sm:$0xff]  ;;  %v260_v40 = vld [vmem:[%s790_s9 + $0x48] sm:$0xff] }
  0x14   : > { %v309_v26 = vmax.f32 %v285_v17, 0.0  ;;  %v310_v27 = vmax.f32 %v286_v18, 0.0  ;;  %v315_v29 = vmax.f32 %v291_v19, 0.0  ;;  %v316_v30 = vmax.f32 %v292_v21, 0.0  ;;  %v265_v41 = vld [vmem:[%s790_s9 + $0x70] sm:$0xff]  ;;  %v266_v42 = vld [vmem:[%s790_s9 + $0x78] sm:$0xff] }
  0x15   : > { %409 = vmatpush.bf16.msra.mxu0 %v642_v2  ;;  %651 = vmatpush.bf16.msra.mxu1 %v642_v2  ;;  %v321_v31 = vmax.f32 %v297_v22, 0.0  ;;  %v322_v32 = vmax.f32 %v298_v23, 0.0  ;;  %v327_v33 = vpack.c.bf16 %v304_v25, %v303_v24  ;;  %v271_v43 = vld [vmem:[%s790_s9 + $0xa0] sm:$0xff]  ;;  %v272_v44 = vld [vmem:[%s790_s9 + $0xa8] sm:$0xff]  ;;  %v281_v45 = vadd.f32 %v792_v5, %v253_v37  ;;  %v273_v8 = vld [vmem:[%s790_s9 + $0xb0] sm:$0xff] }
  0x16   : > { %652 = vmatpush.bf16.msra.mxu2 %v642_v2  ;;  %653 = vmatpush.bf16.msra.mxu3 %v642_v2  ;;  %v330_v34 = vpack.c.bf16 %v310_v27, %v309_v26  ;;  %v333_v35 = vpack.c.bf16 %v316_v30, %v315_v29  ;;  %v282_v46 = vadd.f32 %v792_v5, %v254_v38  ;;  %v255_v1 = vld [vmem:[%s790_s9 + $0x20] sm:$0xff]  ;;  %v256_v2 = vld [vmem:[%s790_s9 + $0x28] sm:$0xff]  ;;  %v274_v9 = vld [vmem:[%s790_s9 + $0xb8] sm:$0xff] }
  0x17   : > { %v336_v36 = vpack.c.bf16 %v322_v32, %v321_v31  ;;  %v287_v47 = vadd.f32 %v792_v5, %v259_v39  ;;  %v288_v48 = vadd.f32 %v792_v5, %v260_v40  ;;  %v293_v49 = vadd.f32 %v792_v5, %v265_v41  ;;  %v268_v7 = vld [vmem:[%s790_s9 + $0x88] sm:$0xff] }
  0x18   : > { %v294_v50 = vadd.f32 %v792_v5, %v266_v42  ;;  %v299_v51 = vadd.f32 %v792_v5, %v271_v43  ;;  %v300_v52 = vadd.f32 %v792_v5, %v272_v44  ;;  %v305_v53 = vmax.f32 %v281_v45, 0.0 }
  0x19   : > { %410 = vmatpush.bf16.msra.mxu0 %v641_v3  ;;  %654 = vmatpush.bf16.msra.mxu1 %v641_v3  ;;  %v306_v54 = vmax.f32 %v282_v46, 0.0  ;;  %v311_v55 = vmax.f32 %v287_v47, 0.0  ;;  %v312_v56 = vmax.f32 %v288_v48, 0.0  ;;  %v317_v57 = vmax.f32 %v293_v49, 0.0 }
  0x1a   : > { %655 = vmatpush.bf16.msra.mxu2 %v641_v3  ;;  %656 = vmatpush.bf16.msra.mxu3 %v641_v3  ;;  %v318_v58 = vmax.f32 %v294_v50, 0.0  ;;  %v323_v59 = vmax.f32 %v299_v51, 0.0  ;;  %v324_v60 = vmax.f32 %v300_v52, 0.0  ;;  %v261_v3 = vld [vmem:[%s790_s9 + $0x50] sm:$0xff]  ;;  %v283_v10 = vadd.f32 %v792_v5, %v255_v1 }
  0x1b   : > { %v328_v61 = vpack.c.bf16 %v306_v54, %v305_v53  ;;  %v331_v62 = vpack.c.bf16 %v312_v56, %v311_v55  ;;  %v284_v11 = vadd.f32 %v792_v5, %v256_v2  ;;  %v289_v12 = vadd.f32 %v792_v5, %v261_v3 }
  0x1c   : > { %v334_v63 = vpack.c.bf16 %v318_v58, %v317_v57  ;;  %v337_v0 = vpack.c.bf16 %v324_v60, %v323_v59  ;;  %v296_v15 = vadd.f32 %v792_v5, %v268_v7  ;;  %v301_v16 = vadd.f32 %v792_v5, %v273_v8 }
  0x1d   : > { %411 = vmatpush.bf16.msra.mxu0 %v640_v4  ;;  %657 = vmatpush.bf16.msra.mxu1 %v640_v4  ;;  %v302_v17 = vadd.f32 %v792_v5, %v274_v9  ;;  %v307_v18 = vmax.f32 %v283_v10, 0.0  ;;  %v308_v19 = vmax.f32 %v284_v11, 0.0 }
  0x1e   : > { %658 = vmatpush.bf16.msra.mxu2 %v640_v4  ;;  %659 = vmatpush.bf16.msra.mxu3 %v640_v4  ;;  %v262_v4 = vld [vmem:[%s790_s9 + $0x58] sm:$0xff]  ;;  %v320_v23 = vmax.f32 %v296_v15, 0.0  ;;  %v325_v24 = vmax.f32 %v301_v16, 0.0 }
  0x1f   : > { %v290_v13 = vadd.f32 %v792_v5, %v262_v4  ;;  %v326_v25 = vmax.f32 %v302_v17, 0.0  ;;  %v329_v26 = vpack.c.bf16 %v308_v19, %v307_v18 }
  0x21   : > { %412 = vmatpush.bf16.msra.mxu0 %v639_v6  ;;  %660 = vmatpush.bf16.msra.mxu1 %v639_v6  ;;  %v314_v21 = vmax.f32 %v290_v13, 0.0  ;;  %v338_v29 = vpack.c.bf16 %v326_v25, %v325_v24 }
  0x22   : > { %661 = vmatpush.bf16.msra.mxu2 %v639_v6  ;;  %662 = vmatpush.bf16.msra.mxu3 %v639_v6  ;;  %v267_v6 = vld [vmem:[%s790_s9 + $0x80] sm:$0xff] }
  0x23   : > { %v295_v14 = vadd.f32 %v792_v5, %v267_v6  ;;  %v854_v5 = vld [vmem:[%s923_s3] ss:$0 sm:$0xff] }
  0x25   : > { %413 = vmatpush.bf16.msra.mxu0 %v638_v20  ;;  %663 = vmatpush.bf16.msra.mxu1 %v638_v20  ;;  %v319_v22 = vmax.f32 %v295_v14, 0.0 }
  0x26   : > { %664 = vmatpush.bf16.msra.mxu2 %v638_v20  ;;  %665 = vmatpush.bf16.msra.mxu3 %v638_v20  ;;  %v313_v20 = vmax.f32 %v289_v12, 0.0 }
  0x28   : > { %v332_v27 = vpack.c.bf16 %v314_v21, %v313_v20 }
  0x29   : > { %414 = vmatpush.bf16.msra.mxu0 %v637_v28  ;;  %666 = vmatpush.bf16.msra.mxu1 %v637_v28 }
  0x2a   : > { %667 = vmatpush.bf16.msra.mxu2 %v637_v28  ;;  %668 = vmatpush.bf16.msra.mxu3 %v637_v28  ;;  %v335_v28 = vpack.c.bf16 %v320_v23, %v319_v22 }
  0x2c   : > { %415 = vmatmul.bf16.vlgmr.msra.gmra.mxu0 %v327_v33  ;;  %430 = vmatmul.bf16.vlgmr.msra.gmra.mxu1 %v330_v34 }
  0x2d   : > { %445 = vmatmul.bf16.vlgmr.msra.gmra.mxu2 %v333_v35  ;;  %460 = vmatmul.bf16.vlgmr.msra.gmra.mxu3 %v336_v36 }
  0x3c   : > { %420 = vmatmul.bf16.gmra.mxu0 %v328_v61  ;;  %435 = vmatmul.bf16.gmra.mxu1 %v331_v62 }
  0x3d   : > { %450 = vmatmul.bf16.gmra.mxu2 %v334_v63  ;;  %465 = vmatmul.bf16.gmra.mxu3 %v337_v0 }
  0x4c   : > { %425 = vmatmul.bf16.gmra.mxu0 %v329_v26  ;;  %440 = vmatmul.bf16.gmra.mxu1 %v332_v27 }
  0x4d   : > { %455 = vmatmul.bf16.gmra.mxu2 %v335_v28  ;;  %470 = vmatmul.bf16.gmra.mxu3 %v338_v29 }
  0xa9   : > { %v416_v30 = vpop.f32.mrf.mxu0  ;;  %v431_v31 = vpop.f32.mrf.mxu1 }
  0xaa   : > { %v417_v32 = vadd.f32 %v854_v5, %v416_v30  ;;  %v432_v33 = vadd.f32 %v854_v5, %v431_v31 }
  0xac   : > { %476 = vst [vmem:[%s861_s24] sm:$0xff] %v417_v32 }
  0xad   : > { %482 = vst [vmem:[%s861_s24 + $0x30] sm:$0xff] %v432_v33 }
  0xb0   : > { %v446_v34 = vpop.f32.mrf.mxu2  ;;  %v461_v35 = vpop.f32.mrf.mxu3 }
  0xb1   : > { %v447_v36 = vadd.f32 %v854_v5, %v446_v34  ;;  %v462_v37 = vadd.f32 %v854_v5, %v461_v35  ;;  %v418_v38 = vpop.f32.mrf.mxu0  ;;  %v433_v39 = vpop.f32.mrf.mxu1 }
  0xb2   : > { %v419_v40 = vadd.f32 %v854_v5, %v418_v38  ;;  %v434_v41 = vadd.f32 %v854_v5, %v433_v39 }
  0xb3   : > { %488 = vst [vmem:[%s861_s24 + $0x60] sm:$0xff] %v447_v36 }
  0xb4   : > { %494 = vst [vmem:[%s861_s24 + $0x90] sm:$0xff] %v462_v37 }
  0xb5   : > { %477 = vst [vmem:[%s861_s24 + $0x8] sm:$0xff] %v419_v40 }
  0xb6   : > { %483 = vst [vmem:[%s861_s24 + $0x38] sm:$0xff] %v434_v41 }
  0xb8   : > { %v448_v42 = vpop.f32.mrf.mxu2  ;;  %v463_v43 = vpop.f32.mrf.mxu3 }
  0xb9   : > { %v449_v44 = vadd.f32 %v854_v5, %v448_v42  ;;  %v464_v45 = vadd.f32 %v854_v5, %v463_v43  ;;  %v421_v46 = vpop.f32.mrf.mxu0  ;;  %v436_v47 = vpop.f32.mrf.mxu1 }
  0xba   : > { %v422_v48 = vadd.f32 %v854_v5, %v421_v46  ;;  %v437_v49 = vadd.f32 %v854_v5, %v436_v47 }
  0xbb   : > { %489 = vst [vmem:[%s861_s24 + $0x68] sm:$0xff] %v449_v44 }
  0xbc   : > { %495 = vst [vmem:[%s861_s24 + $0x98] sm:$0xff] %v464_v45 }
  0xbd   : > { %478 = vst [vmem:[%s861_s24 + $0x10] sm:$0xff] %v422_v48 }
  0xbe   : > { %484 = vst [vmem:[%s861_s24 + $0x40] sm:$0xff] %v437_v49 }
  0xc0   : > { %v451_v50 = vpop.f32.mrf.mxu2  ;;  %v466_v51 = vpop.f32.mrf.mxu3 }
  0xc1   : > { %v452_v52 = vadd.f32 %v854_v5, %v451_v50  ;;  %v467_v53 = vadd.f32 %v854_v5, %v466_v51  ;;  %v423_v54 = vpop.f32.mrf.mxu0  ;;  %v438_v55 = vpop.f32.mrf.mxu1 }
  0xc2   : > { %v424_v56 = vadd.f32 %v854_v5, %v423_v54  ;;  %v439_v57 = vadd.f32 %v854_v5, %v438_v55 }
  0xc3   : > { %490 = vst [vmem:[%s861_s24 + $0x70] sm:$0xff] %v452_v52 }
  0xc4   : > { %496 = vst [vmem:[%s861_s24 + $0xa0] sm:$0xff] %v467_v53 }
  0xc5   : > { %479 = vst [vmem:[%s861_s24 + $0x18] sm:$0xff] %v424_v56 }
  0xc6   : > { %485 = vst [vmem:[%s861_s24 + $0x48] sm:$0xff] %v439_v57 }
  0xc8   : > { %v453_v58 = vpop.f32.mrf.mxu2  ;;  %v468_v59 = vpop.f32.mrf.mxu3 }
  0xc9   : > { %v454_v60 = vadd.f32 %v854_v5, %v453_v58  ;;  %v469_v61 = vadd.f32 %v854_v5, %v468_v59  ;;  %v426_v62 = vpop.f32.mrf.mxu0  ;;  %v441_v63 = vpop.f32.mrf.mxu1 }
  0xca   : > { %v427_v0 = vadd.f32 %v854_v5, %v426_v62  ;;  %v442_v1 = vadd.f32 %v854_v5, %v441_v63 }
  0xcb   : > { %491 = vst [vmem:[%s861_s24 + $0x78] sm:$0xff] %v454_v60 }
  0xcc   : > { %497 = vst [vmem:[%s861_s24 + $0xa8] sm:$0xff] %v469_v61 }
  0xcd   : > { %480 = vst [vmem:[%s861_s24 + $0x20] sm:$0xff] %v427_v0 }
  0xce   : > { %486 = vst [vmem:[%s861_s24 + $0x50] sm:$0xff] %v442_v1 }
  0xd0   : > { %v456_v2 = vpop.f32.mrf.mxu2  ;;  %v471_v3 = vpop.f32.mrf.mxu3 }
  0xd1   : > { %v457_v4 = vadd.f32 %v854_v5, %v456_v2  ;;  %v472_v6 = vadd.f32 %v854_v5, %v471_v3  ;;  %v428_v7 = vpop.f32.mrf.mxu0  ;;  %v443_v8 = vpop.f32.mrf.mxu1 }
  0xd2   : > { %v429_v9 = vadd.f32 %v854_v5, %v428_v7  ;;  %v444_v10 = vadd.f32 %v854_v5, %v443_v8 }
  0xd3   : > { %492 = vst [vmem:[%s861_s24 + $0x80] sm:$0xff] %v457_v4 }
  0xd4   : > { %498 = vst [vmem:[%s861_s24 + $0xb0] sm:$0xff] %v472_v6 }
  0xd5   : > { %481 = vst [vmem:[%s861_s24 + $0x28] sm:$0xff] %v429_v9 }
  0xd6   : > { %487 = vst [vmem:[%s861_s24 + $0x58] sm:$0xff] %v444_v10 }
  0xd8   : > { %v458_v11 = vpop.f32.mrf.mxu2  ;;  %v473_v12 = vpop.f32.mrf.mxu3 }
  0xd9   : > { %v459_v13 = vadd.f32 %v854_v5, %v458_v11  ;;  %v474_v14 = vadd.f32 %v854_v5, %v473_v12 }
  0xdb   : > { %493 = vst [vmem:[%s861_s24 + $0x88] sm:$0xff] %v459_v13 }
  0xdc   : > { %499 = vst [vmem:[%s861_s24 + $0xb8] sm:$0xff] %v474_v14 }
  0xdd PF: > { %s14_s17 = sadd.s32 1, %s718_s17   ;;  %s925_s15 = smov %s714_s16 }
  0xde   : > { %p11_p5 = scmp.ge.s32.totalorder %s14_s17, 4   ;;  %s926_s16 = smov %s928_s18 }
  0xe0   :  { %13 = sbr.rel (!%p11_p5) target bundleno = 2 (0x2), region = 69 }

// kernel: deep_contact_net_forward.2
= control target key start
LH: loop header
LB: loop body
LE: loop exit
PB: predicated region body
PF: predicated region fallthrough
CT: control target
= control target key end

     0   :  { %s2050_s27 = smov 0   ;;  %s2052_s28 = smov 0   ;;  %s2488_s0 = inlined_call_operand.vmem [shape: bf16[2,192,11], index: 0, kind: input, shape index: {}]   ;;  %s2489_s1 = inlined_call_operand.vmem [shape: bf16[2,11,64], index: 1, kind: input, shape index: {}]   ;;  %s2490_s2 = inlined_call_operand.vmem [shape: f32[1,64], index: 2, kind: input, shape index: {}]   ;;  %s2491_s3 = inlined_call_operand.vmem [shape: bf16[64,128], index: 3, kind: input, shape index: {}]   ;;  %s2492_s4 = inlined_call_operand.vmem [shape: f32[1,128], index: 4, kind: input, shape index: {}]   ;;  %s2493_s5 = inlined_call_operand.vmem [shape: bf16[128,384], index: 5, kind: input, shape index: {}]   ;;  %s2494_s6 = inlined_call_operand.vmem [shape: f32[1,256], index: 6, kind: input, shape index: {}]   ;;  %s2495_s7 = inlined_call_operand.vmem [shape: f32[2,192,128], index: 7, kind: output, shape index: {0}]   ;;  %s2496_s8 = inlined_call_operand.vmem [shape: f32[2,1,8,256], index: 8, kind: output, shape index: {1}]  }
   0x1   :  { %s2054_s29 = smov 0  }
   0x2 LB: > { %s31_s30 = sadd.s32 1, %s1998_s28  ;;  %p1691_p0 = scmp.ge.s32.totalorder %s2002_s29, 1  ;;  %s2002_s29 = sphi %s2054_s29, %s19_s29   ;;  %s1998_s28 = sphi %s2052_s28, %s2498_s28   ;;  %s1994_s27 = sphi %s2050_s27, %s2497_s27  }
   0x3   : > { %p33_p1 = scmp.ge.s32.totalorder %s31_s30, 2  ;;  %p298_p2 = scmp.lt.s32.totalorder %s2002_s29, 3 }
   0x5   : > { %s2500_s30 = smov (%p33_p1, %s31_s30), 0  ;;  %p299_p3 = pnand %p1691_p0, %p298_p2 }
   0x6   : > { %p355_p4 = scmp.lt.s32.totalorder (!%p299_p3), %s1994_s27, 1 }
   0x7   : > { %302 = sbr.rel (%p299_p3) target bundleno = 692 (0x2b4), region = 48 }
   0xc   : > { %vm521_vm0 = vcmask 1044480   ;;  %s2502_s27 = smov (!%p355_p4, %s1994_s27), 1  ;;  %vm522_vm1 = vcmask 1045504   ;;  %v2004_v0 = vmov 65535   ;;  %vm484_vm2 = vcmask 89088   ;;  %v1906_v13 = vld [vmem:[%s2491_s3 + $0x18] sm:$0xff] }
   0xd   : > { %v523_v1 = vsel %vm521_vm0, 4294967295, %v2004_v0  ;;  %s1951_s9 = smul.u32 96, %s2502_s27  ;;  %s1888_s10 = sshll.u32 %s2502_s27, 3  ;;  %710 = vmatpush.bf16.msra.mxu1 %v1906_v13  ;;  %1931 = vmatpush.bf16.msra.mxu2 %v1906_v13  ;;  %v1905_v15 = vld [vmem:[%s2491_s3 + $0x10] sm:$0xff]  ;;  %v1904_v16 = vld [vmem:[%s2491_s3 + $0x8] sm:$0xff]  ;;  %v1903_v17 = vld [vmem:[%s2491_s3] sm:$0xff] }
   0xe   : > { %s368_s13 = scalar_lea.vmem %s2489_s1, %s1888_s10  ;;  %v524_v4 = vsel %vm522_vm1, %v523_v1, 0  ;;  %v2112_v21 = vld [vmem:[%s2490_s2] ss:$0 sm:$0xff]  ;;  %vm669_vm3 = vcmask 523264   ;;  %v1928_v63 = vld [vmem:[%s2493_s5 + $0xac] sm:$0xf] }
   0xf   : > { %v1748_v2 = vld [vmem:[%s368_s13] sm:$0xf]  ;;  %v1902_v3 = vld [vmem:[%s368_s13] sm:$0x30]  ;;  %s2078_s16 = scalar_lea.vmem %s2488_s0, %s1951_s9  ;;  %v1878_v0 = vld [vmem:[%s2493_s5 + $0xb4] sm:$0xf0] }
  0x10   : > { %v1749_v5 = vor.u32 %v1902_v3, %v1748_v2  ;;  %v1890_v7 = vld [vmem:[%s2078_s16] sm:$0xff]  ;;  %v1891_v8 = vld [vmem:[%s2078_s16 + $0x8] sm:$0xff]  ;;  %v1892_v9 = vld [vmem:[%s2078_s16 + $0x10] sm:$0xff]  ;;  %v1881_v2 = vor.u32 %v1928_v63, %v1878_v0  ;;  %s1952_s17 = smul.u32 192, %s2502_s27  ;;  %s1889_s23 = sshll.u32 %s2502_s27, 4 }
  0x11   : > { %v1893_v10 = vld [vmem:[%s2078_s16 + $0x18] sm:$0xff]  ;;  %v1894_v11 = vld [vmem:[%s2078_s16 + $0x20] sm:$0xff]  ;;  %v1895_v12 = vld [vmem:[%s2078_s16 + $0x28] sm:$0xff]  ;;  %711 = vmatpush.bf16.msra.mxu1 %v1905_v15  ;;  %1932 = vmatpush.bf16.msra.mxu2 %v1905_v15  ;;  %s2464_s26 = scalar_lea.vmem %s2496_s8, %s1889_s23 }
  0x12   : > { %v526_v6 = vand.u32 %v1749_v5, %v524_v4  ;;  %v1896_v14 = vld [vmem:[%s2078_s16 + $0x30] sm:$0xff]  ;;  %v1897_v18 = vld [vmem:[%s2078_s16 + $0x38] sm:$0xff]  ;;  %v1898_v19 = vld [vmem:[%s2078_s16 + $0x40] sm:$0xff]  ;;  %1040 = vmatpush.bf16.msra.mxu3 %v1881_v2  ;;  %s2348_s20 = scalar_lea.vmem %s2495_s7, %s1952_s17 }
  0x13   : > { %v1899_v28 = vld [vmem:[%s2078_s16 + $0x48] sm:$0xff]  ;;  %v1900_v36 = vld [vmem:[%s2078_s16 + $0x50] sm:$0xff]  ;;  %v1901_v44 = vld [vmem:[%s2078_s16 + $0x58] sm:$0xff] }
  0x14   : > { %535 = vmatpush.bf16.msra.mxu0 %v526_v6  ;;  %v1884_v1 = vld [vmem:[%s2493_s5 + $0xb0] sm:$0xf]  ;;  %v1930_v3 = vld [vmem:[%s2493_s5 + $0xb8] sm:$0xf0]  ;;  %v1929_v2 = vld [vmem:[%s2493_s5 + $0xb0] sm:$0xf0] }
  0x15   : > { %712 = vmatpush.bf16.msra.mxu1 %v1904_v16  ;;  %1933 = vmatpush.bf16.msra.mxu2 %v1904_v16  ;;  %v2150_v6 = vor.u32 %v1930_v3, %v1884_v1  ;;  %v1922_v15 = vld [vmem:[%s2493_s5 + $0x7c] sm:$0xf]  ;;  %v1854_v16 = vld [vmem:[%s2493_s5 + $0x84] sm:$0xf0] }
  0x16   : > { %v1876_v1 = vld [vmem:[%s2493_s5 + $0xa8] sm:$0xf] }
  0x17   : > { %1750 = vmatmul.msk.bf16.vlgmr.msra.gmra.mxu0 %vm484_vm2, %v1890_v7 }
  0x18   : > { %1109 = vmatpush.bf16.msrb.mxu0 %v2150_v6 }
  0x19   : > { %713 = vmatpush.bf16.msra.mxu1 %v1903_v17  ;;  %1934 = vmatpush.bf16.msra.mxu2 %v1903_v17  ;;  %v1860_v17 = vld [vmem:[%s2493_s5 + $0x80] sm:$0xf] }
  0x1d   : > { %1935 = vmatpush.bf16.msrb.mxu1 %v2150_v6 }
  0x27   : > { %1751 = vmatmul.msk.bf16.gmra.mxu0 %vm484_vm2, %v1891_v8  ;;  %v1925_v8 = vld [vmem:[%s2493_s5 + $0x94] sm:$0xf] }
  0x37   : > { %1752 = vmatmul.msk.bf16.gmra.mxu0 %vm484_vm2, %v1892_v9  ;;  %v1866_v9 = vld [vmem:[%s2493_s5 + $0x9c] sm:$0xf0] }
  0x47   : > { %1753 = vmatmul.msk.bf16.gmra.mxu0 %vm484_vm2, %v1893_v10  ;;  %v1872_v10 = vld [vmem:[%s2493_s5 + $0x98] sm:$0xf] }
  0x57   : > { %1754 = vmatmul.msk.bf16.gmra.mxu0 %vm484_vm2, %v1894_v11  ;;  %v1869_v11 = vor.u32 %v1925_v8, %v1866_v9 }
  0x59   : > { %1041 = vmatpush.bf16.msra.mxu3 %v1869_v11 }
  0x67   : > { %1755 = vmatmul.msk.bf16.gmra.mxu0 %vm484_vm2, %v1895_v12  ;;  %v1927_v12 = vld [vmem:[%s2493_s5 + $0xa0] sm:$0xf0] }
  0x68   : > { %v2167_v13 = vor.u32 %v1927_v12, %v1872_v10 }
  0x6a   : > { %1110 = vmatpush.bf16.msrb.mxu0 %v2167_v13  ;;  %1937 = vmatpush.bf16.msrb.mxu1 %v2167_v13 }
  0x77   : > { %1756 = vmatmul.msk.bf16.gmra.mxu0 %vm484_vm2, %v1896_v14 }
  0x87   : > { %1757 = vmatmul.msk.bf16.gmra.mxu0 %vm484_vm2, %v1897_v18  ;;  %v1857_v18 = vor.u32 %v1922_v15, %v1854_v16  ;;  %v1852_v15 = vld [vmem:[%s2493_s5 + $0x78] sm:$0xf]  ;;  %v1923_v16 = vld [vmem:[%s2493_s5 + $0x80] sm:$0xf0] }
  0x89   : > { %1042 = vmatpush.bf16.msra.mxu3 %v1857_v18  ;;  %v2279_v18 = vld [vmem:[%s2492_s4] ss:$0 sm:$0xff] }
  0x94   : > { %v537_v20 = vpop.f32.mrf.mxu0 }
  0x95   : > { %v538_v22 = vadd.f32 %v2112_v21, %v537_v20 }
  0x97   : > { %1758 = vmatmul.msk.bf16.gmra.mxu0 %vm484_vm2, %v1898_v19  ;;  %v597_v25 = vmax.f32 %v538_v22, 0.0  ;;  %v1924_v19 = vld [vmem:[%s2493_s5 + $0x88] sm:$0xf0]  ;;  %v1919_v22 = vld [vmem:[%s2493_s5 + $0x64] sm:$0xf] }
  0x98   : > { %v2183_v20 = vor.u32 %v1924_v19, %v1860_v17  ;;  %v1853_v17 = vor.u32 %v1923_v16, %v1852_v15 }
  0x9a   : > { %1111 = vmatpush.bf16.msrb.mxu0 %v2183_v20  ;;  %1939 = vmatpush.bf16.msrb.mxu1 %v2183_v20 }
  0x9c   : > { %v539_v23 = vpop.f32.mrf.mxu0 }
  0x9d   : > { %v540_v24 = vadd.f32 %v2112_v21, %v539_v23  ;;  %v1842_v23 = vld [vmem:[%s2493_s5 + $0x6c] sm:$0xf0] }
  0x9f   : > { %v598_v26 = vmax.f32 %v540_v24, 0.0  ;;  %v1848_v24 = vld [vmem:[%s2493_s5 + $0x68] sm:$0xf] }
  0xa1   : > { %v621_v27 = vpack.c.bf16 %v598_v26, %v597_v25  ;;  %v1845_v25 = vor.u32 %v1919_v22, %v1842_v23  ;;  %v1921_v26 = vld [vmem:[%s2493_s5 + $0x70] sm:$0xf0]  ;;  %v1840_v22 = vld [vmem:[%s2493_s5 + $0x60] sm:$0xf]  ;;  %v1920_v23 = vld [vmem:[%s2493_s5 + $0x68] sm:$0xf0] }
  0xa3   : > { %1778 = vmatmul.msk.bf16.vlgmr.msra.gmra.mxu1 %vm669_vm3, %v621_v27  ;;  %1043 = vmatpush.bf16.msra.mxu3 %v1845_v25  ;;  %v1841_v25 = vor.u32 %v1920_v23, %v1840_v22 }
  0xa4   : > { %v542_v29 = vpop.f32.mrf.mxu0 }
  0xa5   : > { %v543_v30 = vadd.f32 %v2112_v21, %v542_v29 }
  0xa7   : > { %1759 = vmatmul.msk.bf16.gmra.mxu0 %vm484_vm2, %v1899_v28  ;;  %v599_v33 = vmax.f32 %v543_v30, 0.0  ;;  %v1849_v28 = vor.u32 %v1921_v26, %v1848_v24 }
  0xa9   : > { %1112 = vmatpush.bf16.msrb.mxu0 %v1849_v28  ;;  %1941 = vmatpush.bf16.msrb.mxu1 %v1849_v28 }
  0xac   : > { %v544_v31 = vpop.f32.mrf.mxu0 }
  0xad   : > { %v545_v32 = vadd.f32 %v2112_v21, %v544_v31  ;;  %v1916_v31 = vld [vmem:[%s2493_s5 + $0x4c] sm:$0xf] }
  0xaf   : > { %v600_v34 = vmax.f32 %v545_v32, 0.0  ;;  %v1830_v32 = vld [vmem:[%s2493_s5 + $0x54] sm:$0xf0] }
  0xb1   : > { %v622_v35 = vpack.c.bf16 %v600_v34, %v599_v33  ;;  %v1836_v33 = vld [vmem:[%s2493_s5 + $0x50] sm:$0xf]  ;;  %v1833_v34 = vor.u32 %v1916_v31, %v1830_v32  ;;  %v1917_v31 = vld [vmem:[%s2493_s5 + $0x50] sm:$0xf0] }
  0xb3   : > { %1779 = vmatmul.msk.bf16.gmra.mxu1 %vm669_vm3, %v622_v35  ;;  %v1918_v35 = vld [vmem:[%s2493_s5 + $0x58] sm:$0xf0]  ;;  %1044 = vmatpush.bf16.msra.mxu3 %v1833_v34 }
  0xb4   : > { %v547_v37 = vpop.f32.mrf.mxu0 }
  0xb5   : > { %v548_v38 = vadd.f32 %v2112_v21, %v547_v37 }
  0xb7   : > { %1760 = vmatmul.msk.bf16.gmra.mxu0 %vm484_vm2, %v1900_v36  ;;  %v601_v41 = vmax.f32 %v548_v38, 0.0  ;;  %v1837_v38 = vor.u32 %v1918_v35, %v1836_v33 }
  0xb9   : > { %1113 = vmatpush.bf16.msrb.mxu0 %v1837_v38  ;;  %1943 = vmatpush.bf16.msrb.mxu1 %v1837_v38 }
  0xbc   : > { %v549_v39 = vpop.f32.mrf.mxu0 }
  0xbd   : > { %v550_v40 = vadd.f32 %v2112_v21, %v549_v39 }
  0xbf   : > { %v602_v42 = vmax.f32 %v550_v40, 0.0  ;;  %v1913_v40 = vld [vmem:[%s2493_s5 + $0x34] sm:$0xf] }
  0xc1   : > { %v623_v43 = vpack.c.bf16 %v602_v42, %v601_v41  ;;  %v1818_v41 = vld [vmem:[%s2493_s5 + $0x3c] sm:$0xf0]  ;;  %v1824_v42 = vld [vmem:[%s2493_s5 + $0x38] sm:$0xf] }
  0xc3   : > { %1780 = vmatmul.msk.bf16.gmra.mxu1 %vm669_vm3, %v623_v43  ;;  %v1821_v43 = vor.u32 %v1913_v40, %v1818_v41  ;;  %v1816_v40 = vld [vmem:[%s2493_s5 + $0x30] sm:$0xf]  ;;  %v1914_v41 = vld [vmem:[%s2493_s5 + $0x38] sm:$0xf0] }
  0xc4   : > { %v552_v45 = vpop.f32.mrf.mxu0 }
  0xc5   : > { %v553_v46 = vadd.f32 %v2112_v21, %v552_v45  ;;  %1045 = vmatpush.bf16.msra.mxu3 %v1821_v43  ;;  %v1817_v43 = vor.u32 %v1914_v41, %v1816_v40 }
  0xc7   : > { %1761 = vmatmul.msk.bf16.gmra.mxu0 %vm484_vm2, %v1901_v44  ;;  %v603_v49 = vmax.f32 %v553_v46, 0.0  ;;  %v1915_v44 = vld [vmem:[%s2493_s5 + $0x40] sm:$0xf0] }
  0xc8   : > { %v1825_v45 = vor.u32 %v1915_v44, %v1824_v42  ;;  %v1804_v44 = vld [vmem:[%s2493_s5 + $0x18] sm:$0xf] }
  0xca   : > { %1114 = vmatpush.bf16.msrb.mxu0 %v1825_v45  ;;  %1945 = vmatpush.bf16.msrb.mxu1 %v1825_v45 }
  0xcc   : > { %v554_v47 = vpop.f32.mrf.mxu0 }
  0xcd   : > { %v555_v48 = vadd.f32 %v2112_v21, %v554_v47  ;;  %v1910_v47 = vld [vmem:[%s2493_s5 + $0x1c] sm:$0xf] }
  0xcf   : > { %v604_v50 = vmax.f32 %v555_v48, 0.0  ;;  %v1806_v48 = vld [vmem:[%s2493_s5 + $0x24] sm:$0xf0] }
  0xd1   : > { %v624_v51 = vpack.c.bf16 %v604_v50, %v603_v49  ;;  %v1812_v49 = vld [vmem:[%s2493_s5 + $0x20] sm:$0xf]  ;;  %v1809_v50 = vor.u32 %v1910_v47, %v1806_v48 }
  0xd3   : > { %1781 = vmatmul.msk.bf16.gmra.mxu1 %vm669_vm3, %v624_v51  ;;  %v1912_v51 = vld [vmem:[%s2493_s5 + $0x28] sm:$0xf0]  ;;  %1046 = vmatpush.bf16.msra.mxu3 %v1809_v50 }
  0xd4   : > { %v557_v52 = vpop.f32.mrf.mxu0 }
  0xd5   : > { %v558_v53 = vadd.f32 %v2112_v21, %v557_v52  ;;  %v1813_v52 = vor.u32 %v1912_v51, %v1812_v49 }
  0xd7   : > { %v605_v56 = vmax.f32 %v558_v53, 0.0  ;;  %1115 = vmatpush.bf16.msrb.mxu0 %v1813_v52  ;;  %v1907_v53 = vld [vmem:[%s2493_s5 + $0x4] sm:$0xf]  ;;  %1947 = vmatpush.bf16.msrb.mxu1 %v1813_v52 }
  0xdc   : > { %v559_v54 = vpop.f32.mrf.mxu0 }
  0xdd   : > { %v560_v55 = vadd.f32 %v2112_v21, %v559_v54  ;;  %v1794_v54 = vld [vmem:[%s2493_s5 + $0xc] sm:$0xf0] }
  0xdf   : > { %v606_v57 = vmax.f32 %v560_v55, 0.0  ;;  %v1800_v55 = vld [vmem:[%s2493_s5 + $0x8] sm:$0xf] }
  0xe1   : > { %v625_v58 = vpack.c.bf16 %v606_v57, %v605_v56  ;;  %v1797_v56 = vor.u32 %v1907_v53, %v1794_v54  ;;  %v1909_v57 = vld [vmem:[%s2493_s5 + $0x10] sm:$0xf0]  ;;  %v1792_v53 = vld [vmem:[%s2493_s5] sm:$0xf]  ;;  %v1908_v54 = vld [vmem:[%s2493_s5 + $0x8] sm:$0xf0] }
  0xe3   : > { %1782 = vmatmul.msk.bf16.gmra.mxu1 %vm669_vm3, %v625_v58  ;;  %1047 = vmatpush.bf16.msra.mxu3 %v1797_v56  ;;  %v1793_v56 = vor.u32 %v1908_v54, %v1792_v53 }
  0xe4   : > { %v562_v59 = vpop.f32.mrf.mxu0 }
  0xe5   : > { %v563_v60 = vadd.f32 %v2112_v21, %v562_v59  ;;  %v1801_v59 = vor.u32 %v1909_v57, %v1800_v55 }
  0xe7   : > { %v607_v4 = vmax.f32 %v563_v60, 0.0  ;;  %1116 = vmatpush.bf16.msrb.mxu0 %v1801_v59  ;;  %1936 = vmatpush.bf16.msrb.mxu3 %v2150_v6  ;;  %v1864_v6 = vld [vmem:[%s2493_s5 + $0x90] sm:$0xf] }
  0xe8   : > { %1949 = vmatpush.bf16.msrb.mxu1 %v1801_v59 }
  0xeb   : > { %1938 = vmatpush.bf16.msrb.mxu3 %v2167_v13 }
  0xec   : > { %v564_v61 = vpop.f32.mrf.mxu0 }
  0xed   : > { %v565_v62 = vadd.f32 %v2112_v21, %v564_v61 }
  0xef   : > { %v608_v5 = vmax.f32 %v565_v62, 0.0  ;;  %1940 = vmatpush.bf16.msrb.mxu3 %v2183_v20 }
  0xf1   : > { %v626_v7 = vpack.c.bf16 %v608_v5, %v607_v4  ;;  %v1877_v4 = vor.u32 %v1929_v2, %v1876_v1 }
  0xf3   : > { %1783 = vmatmul.msk.bf16.gmra.mxu1 %vm669_vm3, %v626_v7  ;;  %971 = vmatpush.bf16.msrb.mxu2 %v1877_v4  ;;  %v1926_v7 = vld [vmem:[%s2493_s5 + $0x98] sm:$0xf0] }
  0xf4   : > { %v567_v14 = vpop.f32.mrf.mxu0  ;;  %1942 = vmatpush.bf16.msrb.mxu3 %v1849_v28  ;;  %v1865_v9 = vor.u32 %v1926_v7, %v1864_v6 }
  0xf5   : > { %v568_v27 = vadd.f32 %v2112_v21, %v567_v14 }
  0xf7   : > { %v609_v36 = vmax.f32 %v568_v27, 0.0  ;;  %972 = vmatpush.bf16.msrb.mxu2 %v1865_v9 }
  0xf8   : > { %1944 = vmatpush.bf16.msrb.mxu3 %v1837_v38 }
  0xfb   : > { %973 = vmatpush.bf16.msrb.mxu2 %v1853_v17 }
  0xfc   : > { %v569_v29 = vpop.f32.mrf.mxu0  ;;  %1946 = vmatpush.bf16.msrb.mxu3 %v1825_v45  ;;  %v1911_v45 = vld [vmem:[%s2493_s5 + $0x20] sm:$0xf0] }
  0xfd   : > { %v570_v30 = vadd.f32 %v2112_v21, %v569_v29 }
  0xff   : > { %v610_v37 = vmax.f32 %v570_v30, 0.0  ;;  %974 = vmatpush.bf16.msrb.mxu2 %v1841_v25  ;;  %v1828_v30 = vld [vmem:[%s2493_s5 + $0x48] sm:$0xf] }
 0x100   : > { %1948 = vmatpush.bf16.msrb.mxu3 %v1813_v52  ;;  %v1829_v33 = vor.u32 %v1917_v31, %v1828_v30 }
 0x101   : > { %v627_v39 = vpack.c.bf16 %v610_v37, %v609_v36 }
 0x103   : > { %1784 = vmatmul.msk.bf16.gmra.mxu1 %vm669_vm3, %v627_v39  ;;  %975 = vmatpush.bf16.msrb.mxu2 %v1829_v33 }
 0x104   : > { %v572_v46 = vpop.f32.mrf.mxu0  ;;  %1950 = vmatpush.bf16.msrb.mxu3 %v1801_v59 }
 0x105   : > { %v573_v58 = vadd.f32 %v2112_v21, %v572_v46  ;;  %v1805_v46 = vor.u32 %v1911_v45, %v1804_v44 }
 0x107   : > { %v611_v62 = vmax.f32 %v573_v58, 0.0  ;;  %976 = vmatpush.bf16.msrb.mxu2 %v1817_v43 }
 0x10b   : > { %977 = vmatpush.bf16.msrb.mxu2 %v1805_v46 }
 0x10c   : > { %v574_v60 = vpop.f32.mrf.mxu0 }
 0x10d   : > { %v575_v61 = vadd.f32 %v2112_v21, %v574_v60 }
 0x10f   : > { %v612_v63 = vmax.f32 %v575_v61, 0.0  ;;  %978 = vmatpush.bf16.msrb.mxu2 %v1793_v56 }
 0x111   : > { %v628_v0 = vpack.c.bf16 %v612_v63, %v611_v62 }
 0x113   : > { %1785 = vmatmul.msk.bf16.gmra.mxu1 %vm669_vm3, %v628_v0 }
 0x114   : > { %v577_v3 = vpop.f32.mrf.mxu0 }
 0x115   : > { %v578_v5 = vadd.f32 %v2112_v21, %v577_v3 }
 0x117   : > { %v613_v11 = vmax.f32 %v578_v5, 0.0 }
 0x11c   : > { %v579_v8 = vpop.f32.mrf.mxu0 }
 0x11d   : > { %v580_v10 = vadd.f32 %v2112_v21, %v579_v8 }
 0x11f   : > { %v614_v12 = vmax.f32 %v580_v10, 0.0 }
 0x120   : > { %v715_v13 = vpop.f32.mrf.mxu1 }
 0x121   : > { %v629_v14 = vpack.c.bf16 %v614_v12, %v613_v11  ;;  %v716_v20 = vadd.f32 %v2279_v18, %v715_v13 }
 0x123   : > { %1786 = vmatmul.msk.bf16.gmra.mxu1 %vm669_vm3, %v629_v14  ;;  %v775_v27 = vmax.f32 %v716_v20, 0.0 }
 0x124   : > { %v582_v19 = vpop.f32.mrf.mxu0 }
 0x125   : > { %v583_v28 = vadd.f32 %v2112_v21, %v582_v19 }
 0x127   : > { %v615_v36 = vmax.f32 %v583_v28, 0.0 }
 0x128   : > { %v717_v24 = vpop.f32.mrf.mxu1 }
 0x129   : > { %v718_v26 = vadd.f32 %v2279_v18, %v717_v24 }
 0x12b   : > { %v776_v29 = vmax.f32 %v718_v26, 0.0 }
 0x12c   : > { %v584_v32 = vpop.f32.mrf.mxu0 }
 0x12d   : > { %v585_v34 = vadd.f32 %v2112_v21, %v584_v32  ;;  %v2298_v35 = vpack.c.bf16 %v776_v29, %v775_v27 }
 0x12f   : > { %v616_v37 = vmax.f32 %v585_v34, 0.0  ;;  %1048 = vmatmul.bf16.vlgmr.msra.gmra.mxu3 %v2298_v35  ;;  %1117 = vmatmul.bf16.vlgmr.msrb.gmra.mxu0 %v2298_v35 }
 0x130   : > { %v720_v38 = vpop.f32.mrf.mxu1 }
 0x131   : > { %v630_v39 = vpack.c.bf16 %v616_v37, %v615_v36  ;;  %v721_v47 = vadd.f32 %v2279_v18, %v720_v38 }
 0x133   : > { %1787 = vmatmul.msk.bf16.vlgmr.msra.gmra.mxu2 %vm669_vm3, %v630_v39  ;;  %v777_v50 = vmax.f32 %v721_v47, 0.0 }
 0x134   : > { %v587_v42 = vpop.f32.mrf.mxu0 }
 0x135   : > { %v588_v51 = vadd.f32 %v2112_v21, %v587_v42 }
 0x137   : > { %v617_v59 = vmax.f32 %v588_v51, 0.0 }
 0x138   : > { %v722_v48 = vpop.f32.mrf.mxu1 }
 0x139   : > { %v723_v49 = vadd.f32 %v2279_v18, %v722_v48 }
 0x13b   : > { %v778_v52 = vmax.f32 %v723_v49, 0.0 }
 0x13c   : > { %v589_v55 = vpop.f32.mrf.mxu0 }
 0x13d   : > { %v590_v57 = vadd.f32 %v2112_v21, %v589_v55  ;;  %v800_v58 = vpack.c.bf16 %v778_v52, %v777_v50 }
 0x13f   : > { %v618_v60 = vmax.f32 %v590_v57, 0.0  ;;  %1053 = vmatmul.bf16.gmra.mxu3 %v800_v58  ;;  %1122 = vmatmul.bf16.gmra.mxu0 %v800_v58 }
 0x140   : > { %v725_v61 = vpop.f32.mrf.mxu1 }
 0x141   : > { %v631_v62 = vpack.c.bf16 %v618_v60, %v617_v59  ;;  %v726_v0 = vadd.f32 %v2279_v18, %v725_v61  ;;  %v2359_v59 = vld [vmem:[%s2494_s6] sm:$0x3] }
 0x143   : > { %1788 = vmatmul.msk.bf16.gmra.mxu2 %vm669_vm3, %v631_v62  ;;  %v779_v3 = vmax.f32 %v726_v0, 0.0  ;;  %v2362_v62 = vperm.slane %v2359_v59, 1 }
 0x144   : > { %v592_v63 = vpop.f32.mrf.mxu0 }
 0x145   : > { %v593_v4 = vadd.f32 %v2112_v21, %v592_v63 }
 0x147   : > { %v619_v9 = vmax.f32 %v593_v4, 0.0 }
 0x148   : > { %v727_v1 = vpop.f32.mrf.mxu1 }
 0x149   : > { %v728_v2 = vadd.f32 %v2279_v18, %v727_v1 }
 0x14b   : > { %v780_v5 = vmax.f32 %v728_v2, 0.0 }
 0x14c   : > { %v594_v6 = vpop.f32.mrf.mxu0 }
 0x14d   : > { %v595_v7 = vadd.f32 %v2112_v21, %v594_v6  ;;  %v801_v8 = vpack.c.bf16 %v780_v5, %v779_v3 }
 0x14f   : > { %v620_v10 = vmax.f32 %v595_v7, 0.0  ;;  %1058 = vmatmul.bf16.gmra.mxu3 %v801_v8  ;;  %1127 = vmatmul.bf16.gmra.mxu0 %v801_v8 }
 0x150   : > { %v730_v11 = vpop.f32.mrf.mxu1 }
 0x151   : > { %v632_v12 = vpack.c.bf16 %v620_v10, %v619_v9  ;;  %v731_v13 = vadd.f32 %v2279_v18, %v730_v11 }
 0x153   : > { %1789 = vmatmul.msk.bf16.gmra.mxu2 %vm669_vm3, %v632_v12  ;;  %v781_v16 = vmax.f32 %v731_v13, 0.0 }
 0x158   : > { %v732_v14 = vpop.f32.mrf.mxu1 }
 0x159   : > { %v733_v15 = vadd.f32 %v2279_v18, %v732_v14 }
 0x15b   : > { %v782_v17 = vmax.f32 %v733_v15, 0.0 }
 0x15d   : > { %v802_v19 = vpack.c.bf16 %v782_v17, %v781_v16 }
 0x15f   : > { %1063 = vmatmul.bf16.gmra.mxu3 %v802_v19  ;;  %1132 = vmatmul.bf16.gmra.mxu0 %v802_v19 }
 0x160   : > { %v735_v21 = vpop.f32.mrf.mxu1 }
 0x161   : > { %v736_v20 = vadd.f32 %v2279_v18, %v735_v21 }
 0x163   : > { %979 = vmatmul.bf16.vlgmr.msrb.gmra.mxu2 %v2298_v35  ;;  %v783_v24 = vmax.f32 %v736_v20, 0.0 }
 0x168   : > { %v737_v22 = vpop.f32.mrf.mxu1 }
 0x169   : > { %v738_v23 = vadd.f32 %v2279_v18, %v737_v22 }
 0x16b   : > { %v784_v25 = vmax.f32 %v738_v23, 0.0 }
 0x16d   : > { %v803_v26 = vpack.c.bf16 %v784_v25, %v783_v24 }
 0x16f   : > { %1068 = vmatmul.bf16.gmra.mxu3 %v803_v26  ;;  %1137 = vmatmul.bf16.vlgmr.msrb.gmra.mxu1 %v803_v26 }
 0x170   : > { %v740_v27 = vpop.f32.mrf.mxu1 }
 0x171   : > { %v741_v28 = vadd.f32 %v2279_v18, %v740_v27 }
 0x173   : > { %984 = vmatmul.bf16.gmra.mxu2 %v800_v58  ;;  %v785_v31 = vmax.f32 %v741_v28, 0.0 }
 0x178   : > { %v742_v29 = vpop.f32.mrf.mxu1 }
 0x179   : > { %v743_v30 = vadd.f32 %v2279_v18, %v742_v29 }
 0x17b   : > { %v786_v32 = vmax.f32 %v743_v30, 0.0 }
 0x17d   : > { %v804_v33 = vpack.c.bf16 %v786_v32, %v785_v31 }
 0x17f   : > { %1073 = vmatmul.bf16.gmra.mxu3 %v804_v33  ;;  %1142 = vmatmul.bf16.gmra.mxu1 %v804_v33 }
 0x180   : > { %v745_v34 = vpop.f32.mrf.mxu1 }
 0x181   : > { %v746_v35 = vadd.f32 %v2279_v18, %v745_v34 }
 0x183   : > { %989 = vmatmul.bf16.gmra.mxu2 %v801_v8  ;;  %v787_v38 = vmax.f32 %v746_v35, 0.0 }
 0x188   : > { %v747_v36 = vpop.f32.mrf.mxu1 }
 0x189   : > { %v748_v37 = vadd.f32 %v2279_v18, %v747_v36 }
 0x18b   : > { %v788_v39 = vmax.f32 %v748_v37, 0.0 }
 0x18d   : > { %v805_v40 = vpack.c.bf16 %v788_v39, %v787_v38 }
 0x18f   : > { %1078 = vmatmul.bf16.gmra.mxu3 %v805_v40  ;;  %1147 = vmatmul.bf16.gmra.mxu1 %v805_v40 }
 0x190   : > { %v750_v41 = vpop.f32.mrf.mxu1 }
 0x191   : > { %v751_v42 = vadd.f32 %v2279_v18, %v750_v41 }
 0x193   : > { %994 = vmatmul.bf16.gmra.mxu2 %v802_v19  ;;  %v789_v45 = vmax.f32 %v751_v42, 0.0 }
 0x198   : > { %v752_v43 = vpop.f32.mrf.mxu1 }
 0x199   : > { %v753_v44 = vadd.f32 %v2279_v18, %v752_v43 }
 0x19b   : > { %v790_v46 = vmax.f32 %v753_v44, 0.0 }
 0x19d   : > { %v806_v47 = vpack.c.bf16 %v790_v46, %v789_v45 }
 0x19f   : > { %1083 = vmatmul.bf16.gmra.mxu3 %v806_v47  ;;  %1152 = vmatmul.bf16.gmra.mxu1 %v806_v47 }
 0x1a0   : > { %v755_v48 = vpop.f32.mrf.mxu1 }
 0x1a1   : > { %v756_v49 = vadd.f32 %v2279_v18, %v755_v48 }
 0x1a3   : > { %999 = vmatmul.bf16.gmra.mxu2 %v803_v26  ;;  %v791_v52 = vmax.f32 %v756_v49, 0.0 }
 0x1a8   : > { %v757_v50 = vpop.f32.mrf.mxu1 }
 0x1a9   : > { %v758_v51 = vadd.f32 %v2279_v18, %v757_v50 }
 0x1ab   : > { %v792_v53 = vmax.f32 %v758_v51, 0.0 }
 0x1ac   : > { %v1118_v54 = vpop.f32.mrf.mxu0 }
 0x1ad   : > { %v2350_v55 = vpack.c.bf16 %v792_v53, %v791_v52  ;;  %1511 = vst [vmem:[%s2348_s20] sm:$0xff] %v1118_v54 }
 0x1af   : > { %1088 = vmatmul.bf16.gmra.mxu3 %v2350_v55  ;;  %1157 = vmatmul.bf16.gmra.mxu1 %v2350_v55 }
 0x1b2   : > { %v1049_v56 = vpop.f32.mrf.mxu3 }
 0x1b3   : > { %1004 = vmatmul.bf16.gmra.mxu2 %v804_v33  ;;  %v1185_v2 = vadd.f32 %v2362_v62, %v1049_v56 }
 0x1b4   : > { %v1120_v57 = vpop.f32.mrf.mxu0 }
 0x1b5   : > { %1512 = vst [vmem:[%s2348_s20 + $0x8] sm:$0xff] %v1120_v57  ;;  %v1233_v9 = vmax.f32 %v1185_v2, 0.0 }
 0x1b6   : > { %v760_v58 = vpop.f32.mrf.mxu2 }
 0x1b7   : > { %v761_v63 = vadd.f32 %v2279_v18, %v760_v58 }
 0x1b9   : > { %v793_v3 = vmax.f32 %v761_v63, 0.0 }
 0x1ba   : > { %v1051_v60 = vpop.f32.mrf.mxu3 }
 0x1bb   : > { %v1187_v13 = vadd.f32 %v2362_v62, %v1051_v60 }
 0x1bc   : > { %v1123_v61 = vpop.f32.mrf.mxu0 }
 0x1bd   : > { %1513 = vst [vmem:[%s2348_s20 + $0x10] sm:$0xff] %v1123_v61  ;;  %v1235_v17 = vmax.f32 %v1187_v13, 0.0 }
 0x1be   : > { %v762_v0 = vpop.f32.mrf.mxu2 }
 0x1bf   : > { %v763_v1 = vadd.f32 %v2279_v18, %v762_v0 }
 0x1c1   : > { %v794_v4 = vmax.f32 %v763_v1, 0.0 }
 0x1c2   : > { %v1054_v5 = vpop.f32.mrf.mxu3 }
 0x1c3   : > { %v1189_v6 = vadd.f32 %v2362_v62, %v1054_v5  ;;  %1009 = vmatmul.bf16.gmra.mxu2 %v805_v40  ;;  %v2369_v7 = vpack.c.bf16 %v794_v4, %v793_v3 }
 0x1c4   : > { %v1125_v8 = vpop.f32.mrf.mxu0 }
 0x1c5   : > { %v1237_v10 = vmax.f32 %v1189_v6, 0.0  ;;  %1514 = vst [vmem:[%s2348_s20 + $0x18] sm:$0xff] %v1125_v8  ;;  %1093 = vmatmul.bf16.gmra.mxu3 %v2369_v7  ;;  %1162 = vmatmul.bf16.gmra.mxu1 %v2369_v7 }
 0x1c6   : > { %v765_v11 = vpop.f32.mrf.mxu2 }
 0x1c7   : > { %v1480_v12 = vmax.f32 %v1233_v9, %v1237_v10  ;;  %v766_v19 = vadd.f32 %v2279_v18, %v765_v11 }
 0x1c9   : > { %v795_v24 = vmax.f32 %v766_v19, 0.0 }
 0x1ca   : > { %v1056_v14 = vpop.f32.mrf.mxu3 }
 0x1cb   : > { %v1191_v15 = vadd.f32 %v2362_v62, %v1056_v14 }
 0x1cc   : > { %v1128_v16 = vpop.f32.mrf.mxu0 }
 0x1cd   : > { %v1239_v21 = vmax.f32 %v1191_v15, 0.0  ;;  %1515 = vst [vmem:[%s2348_s20 + $0x20] sm:$0xff] %v1128_v16 }
 0x1ce   : > { %v767_v20 = vpop.f32.mrf.mxu2 }
 0x1cf   : > { %v1481_v22 = vmax.f32 %v1235_v17, %v1239_v21  ;;  %v768_v23 = vadd.f32 %v2279_v18, %v767_v20 }
 0x1d1   : > { %v796_v25 = vmax.f32 %v768_v23, 0.0 }
 0x1d2   : > { %v1059_v26 = vpop.f32.mrf.mxu3 }
 0x1d3   : > { %v1193_v27 = vadd.f32 %v2362_v62, %v1059_v26  ;;  %1014 = vmatmul.bf16.gmra.mxu2 %v806_v47  ;;  %v2380_v28 = vpack.c.bf16 %v796_v25, %v795_v24 }
 0x1d4   : > { %v1130_v29 = vpop.f32.mrf.mxu0 }
 0x1d5   : > { %v1241_v30 = vmax.f32 %v1193_v27, 0.0  ;;  %1516 = vst [vmem:[%s2348_s20 + $0x28] sm:$0xff] %v1130_v29  ;;  %1098 = vmatmul.bf16.gmra.mxu3 %v2380_v28  ;;  %1167 = vmatmul.bf16.gmra.mxu1 %v2380_v28 }
 0x1d6   : > { %v770_v31 = vpop.f32.mrf.mxu2 }
 0x1d7   : > { %v1482_v32 = vmax.f32 %v1480_v12, %v1241_v30  ;;  %v771_v36 = vadd.f32 %v2279_v18, %v770_v31 }
 0x1d9   : > { %v797_v41 = vmax.f32 %v771_v36, 0.0 }
 0x1da   : > { %v1061_v33 = vpop.f32.mrf.mxu3 }
 0x1db   : > { %v1195_v34 = vadd.f32 %v2362_v62, %v1061_v33 }
 0x1dc   : > { %v1133_v35 = vpop.f32.mrf.mxu0 }
 0x1dd   : > { %v1243_v37 = vmax.f32 %v1195_v34, 0.0  ;;  %1517 = vst [vmem:[%s2348_s20 + $0x30] sm:$0xff] %v1133_v35 }
 0x1de   : > { %v772_v38 = vpop.f32.mrf.mxu2 }
 0x1df   : > { %v1483_v39 = vmax.f32 %v1481_v22, %v1243_v37  ;;  %v773_v40 = vadd.f32 %v2279_v18, %v772_v38 }
 0x1e1   : > { %v798_v42 = vmax.f32 %v773_v40, 0.0 }
 0x1e2   : > { %v1064_v43 = vpop.f32.mrf.mxu3 }
 0x1e3   : > { %v1197_v44 = vadd.f32 %v2362_v62, %v1064_v43  ;;  %1019 = vmatmul.bf16.gmra.mxu2 %v2350_v55  ;;  %v2391_v45 = vpack.c.bf16 %v798_v42, %v797_v41  ;;  %v2398_v55 = vperm.slane %v2359_v59, 0 }
 0x1e4   : > { %v1135_v46 = vpop.f32.mrf.mxu0 }
 0x1e5   : > { %v1245_v47 = vmax.f32 %v1197_v44, 0.0  ;;  %1518 = vst [vmem:[%s2348_s20 + $0x38] sm:$0xff] %v1135_v46  ;;  %1103 = vmatmul.bf16.gmra.mxu3 %v2391_v45 }
 0x1e6   : > { %v980_v48 = vpop.f32.mrf.mxu2 }
 0x1e7   : > { %v1484_v49 = vmax.f32 %v1482_v32, %v1245_v47  ;;  %v1184_v60 = vadd.f32 %v2398_v55, %v980_v48 }
 0x1e9   : > { %v1232_v2 = vmax.f32 %v1184_v60, 0.0 }
 0x1ea   : > { %v1066_v50 = vpop.f32.mrf.mxu3 }
 0x1eb   : > { %v1199_v18 = vadd.f32 %v2362_v62, %v1066_v50 }
 0x1ec   : > { %v1138_v51 = vpop.f32.mrf.mxu1 }
 0x1ed   : > { %v1247_v52 = vmax.f32 %v1199_v18, 0.0  ;;  %1519 = vst [vmem:[%s2348_s20 + $0x40] sm:$0xff] %v1138_v51 }
 0x1ee   : > { %v982_v53 = vpop.f32.mrf.mxu2 }
 0x1ef   : > { %v1485_v54 = vmax.f32 %v1483_v39, %v1247_v52 }
 0x1f2   : > { %v1069_v56 = vpop.f32.mrf.mxu3 }
 0x1f3   : > { %v1201_v57 = vadd.f32 %v2362_v62, %v1069_v56  ;;  %1024 = vmatmul.bf16.gmra.mxu2 %v2369_v7  ;;  %v1186_v7 = vadd.f32 %v2398_v55, %v982_v53 }
 0x1f4   : > { %v1140_v58 = vpop.f32.mrf.mxu1 }
 0x1f5   : > { %v1249_v61 = vmax.f32 %v1201_v57, 0.0  ;;  %1520 = vst [vmem:[%s2348_s20 + $0x48] sm:$0xff] %v1140_v58  ;;  %1172 = vmatmul.bf16.vlgmr.msrb.gmra.mxu3 %v2391_v45  ;;  %v1234_v12 = vmax.f32 %v1186_v7, 0.0 }
 0x1f6   : > { %v985_v63 = vpop.f32.mrf.mxu2 }
 0x1f7   : > { %v1486_v0 = vmax.f32 %v1484_v49, %v1249_v61  ;;  %v1188_v1 = vadd.f32 %v2398_v55, %v985_v63 }
 0x1f9   : > { %v1236_v59 = vmax.f32 %v1188_v1, 0.0 }
 0x1fa   : > { %v1071_v3 = vpop.f32.mrf.mxu3 }
 0x1fb   : > { %v1451_v4 = vmax.f32 %v1232_v2, %v1236_v59  ;;  %v1203_v5 = vadd.f32 %v2362_v62, %v1071_v3 }
 0x1fc   : > { %v1143_v6 = vpop.f32.mrf.mxu1 }
 0x1fd   : > { %v1251_v8 = vmax.f32 %v1203_v5, 0.0  ;;  %1521 = vst [vmem:[%s2348_s20 + $0x50] sm:$0xff] %v1143_v6 }
 0x1fe   : > { %v987_v9 = vpop.f32.mrf.mxu2 }
 0x1ff   : > { %v1487_v10 = vmax.f32 %v1485_v54, %v1251_v8  ;;  %v1190_v11 = vadd.f32 %v2398_v55, %v987_v9 }
 0x201   : > { %v1238_v13 = vmax.f32 %v1190_v11, 0.0 }
 0x202   : > { %v1074_v14 = vpop.f32.mrf.mxu3 }
 0x203   : > { %v1452_v15 = vmax.f32 %v1234_v12, %v1238_v13  ;;  %v1205_v16 = vadd.f32 %v2362_v62, %v1074_v14  ;;  %1029 = vmatmul.bf16.gmra.mxu2 %v2380_v28 }
 0x204   : > { %v1145_v17 = vpop.f32.mrf.mxu1 }
 0x205   : > { %v1253_v19 = vmax.f32 %v1205_v16, 0.0  ;;  %1522 = vst [vmem:[%s2348_s20 + $0x58] sm:$0xff] %v1145_v17 }
 0x206   : > { %v990_v21 = vpop.f32.mrf.mxu2 }
 0x207   : > { %v1488_v20 = vmax.f32 %v1486_v0, %v1253_v19  ;;  %v1192_v22 = vadd.f32 %v2398_v55, %v990_v21 }
 0x209   : > { %v1240_v23 = vmax.f32 %v1192_v22, 0.0 }
 0x20a   : > { %v1076_v24 = vpop.f32.mrf.mxu3 }
 0x20b   : > { %v1453_v25 = vmax.f32 %v1451_v4, %v1240_v23  ;;  %v1207_v26 = vadd.f32 %v2362_v62, %v1076_v24 }
 0x20c   : > { %v1148_v27 = vpop.f32.mrf.mxu1 }
 0x20d   : > { %v1255_v29 = vmax.f32 %v1207_v26, 0.0  ;;  %1523 = vst [vmem:[%s2348_s20 + $0x60] sm:$0xff] %v1148_v27 }
 0x20e   : > { %v992_v30 = vpop.f32.mrf.mxu2 }
 0x20f   : > { %v1489_v31 = vmax.f32 %v1487_v10, %v1255_v29  ;;  %v1194_v28 = vadd.f32 %v2398_v55, %v992_v30 }
 0x211   : > { %v1242_v32 = vmax.f32 %v1194_v28, 0.0 }
 0x212   : > { %v1079_v33 = vpop.f32.mrf.mxu3 }
 0x213   : > { %v1454_v34 = vmax.f32 %v1452_v15, %v1242_v32  ;;  %v1209_v35 = vadd.f32 %v2362_v62, %v1079_v33  ;;  %1034 = vmatmul.bf16.gmra.mxu2 %v2391_v45 }
 0x214   : > { %v1150_v36 = vpop.f32.mrf.mxu1 }
 0x215   : > { %v1257_v37 = vmax.f32 %v1209_v35, 0.0  ;;  %1524 = vst [vmem:[%s2348_s20 + $0x68] sm:$0xff] %v1150_v36 }
 0x216   : > { %v995_v38 = vpop.f32.mrf.mxu2 }
 0x217   : > { %v1490_v39 = vmax.f32 %v1488_v20, %v1257_v37  ;;  %v1196_v40 = vadd.f32 %v2398_v55, %v995_v38 }
 0x219   : > { %v1244_v41 = vmax.f32 %v1196_v40, 0.0 }
 0x21a   : > { %v1081_v42 = vpop.f32.mrf.mxu3 }
 0x21b   : > { %v1455_v43 = vmax.f32 %v1453_v25, %v1244_v41  ;;  %v1211_v44 = vadd.f32 %v2362_v62, %v1081_v42 }
 0x21c   : > { %v1153_v46 = vpop.f32.mrf.mxu1 }
 0x21d   : > { %v1259_v47 = vmax.f32 %v1211_v44, 0.0  ;;  %1525 = vst [vmem:[%s2348_s20 + $0x70] sm:$0xff] %v1153_v46 }
 0x21e   : > { %v997_v48 = vpop.f32.mrf.mxu2 }
 0x21f   : > { %v2423_v49 = vmax.f32 %v1489_v31, %v1259_v47  ;;  %v1198_v45 = vadd.f32 %v2398_v55, %v997_v48 }
 0x221   : > { %v1246_v50 = vmax.f32 %v1198_v45, 0.0 }
 0x222   : > { %v1084_v18 = vpop.f32.mrf.mxu3 }
 0x223   : > { %v1456_v51 = vmax.f32 %v1454_v34, %v1246_v50  ;;  %v1213_v52 = vadd.f32 %v2362_v62, %v1084_v18 }
 0x224   : > { %v1155_v53 = vpop.f32.mrf.mxu1 }
 0x225   : > { %v1261_v54 = vmax.f32 %v1213_v52, 0.0  ;;  %1526 = vst [vmem:[%s2348_s20 + $0x78] sm:$0xff] %v1155_v53 }
 0x226   : > { %v1000_v56 = vpop.f32.mrf.mxu2 }
 0x227   : > { %v2428_v57 = vmax.f32 %v1490_v39, %v1261_v54  ;;  %v1200_v58 = vadd.f32 %v2398_v55, %v1000_v56 }
 0x229   : > { %v1248_v60 = vmax.f32 %v1200_v58, 0.0 }
 0x22a   : > { %v1086_v63 = vpop.f32.mrf.mxu3 }
 0x22b   : > { %v1457_v61 = vmax.f32 %v1455_v43, %v1248_v60  ;;  %v1215_v37 = vadd.f32 %v2362_v62, %v1086_v63 }
 0x22c   : > { %v1158_v0 = vpop.f32.mrf.mxu1 }
 0x22d   : > { %1527 = vst [vmem:[%s2348_s20 + $0x80] sm:$0xff] %v1158_v0  ;;  %v1263_v42 = vmax.f32 %v1215_v37, 0.0 }
 0x22e   : > { %v1002_v1 = vpop.f32.mrf.mxu2 }
 0x22f   : > { %v1202_v2 = vadd.f32 %v2398_v55, %v1002_v1  ;;  %v1493_v50 = vmax.f32 %v2423_v49, %v1263_v42 }
 0x231   : > { %v1250_v59 = vmax.f32 %v1202_v2, 0.0 }
 0x232   : > { %v1089_v5 = vpop.f32.mrf.mxu3 }
 0x233   : > { %v1458_v3 = vmax.f32 %v1456_v51, %v1250_v59  ;;  %v1217_v39 = vadd.f32 %v2362_v62, %v1089_v5 }
 0x234   : > { %v1160_v4 = vpop.f32.mrf.mxu1 }
 0x235   : > { %1528 = vst [vmem:[%s2348_s20 + $0x88] sm:$0xff] %v1160_v4  ;;  %v1265_v46 = vmax.f32 %v1217_v39, 0.0 }
 0x236   : > { %v1005_v6 = vpop.f32.mrf.mxu2 }
 0x237   : > { %v1204_v7 = vadd.f32 %v2398_v55, %v1005_v6  ;;  %v1494_v54 = vmax.f32 %v2428_v57, %v1265_v46 }
 0x239   : > { %v1252_v8 = vmax.f32 %v1204_v7, 0.0 }
 0x23a   : > { %v1091_v12 = vpop.f32.mrf.mxu3 }
 0x23b   : > { %v1459_v9 = vmax.f32 %v1457_v61, %v1252_v8  ;;  %v1219_v40 = vadd.f32 %v2362_v62, %v1091_v12 }
 0x23d   : > { %v1267_v47 = vmax.f32 %v1219_v40, 0.0 }
 0x23e   : > { %v1007_v10 = vpop.f32.mrf.mxu2 }
 0x23f   : > { %v1206_v11 = vadd.f32 %v2398_v55, %v1007_v10  ;;  %v1495_v56 = vmax.f32 %v1493_v50, %v1267_v47 }
 0x241   : > { %v1254_v13 = vmax.f32 %v1206_v11, 0.0 }
 0x242   : > { %v1163_v14 = vpop.f32.mrf.mxu1 }
 0x243   : > { %v1460_v15 = vmax.f32 %v1458_v3, %v1254_v13  ;;  %1529 = vst [vmem:[%s2348_s20 + $0x90] sm:$0xff] %v1163_v14 }
 0x246   : > { %v1010_v16 = vpop.f32.mrf.mxu2 }
 0x247   : > { %v1208_v17 = vadd.f32 %v2398_v55, %v1010_v16 }
 0x248   : > { %v1094_v19 = vpop.f32.mrf.mxu3 }
 0x249   : > { %v1256_v21 = vmax.f32 %v1208_v17, 0.0  ;;  %v1221_v43 = vadd.f32 %v2362_v62, %v1094_v19 }
 0x24a   : > { %v1165_v20 = vpop.f32.mrf.mxu1 }
 0x24b   : > { %v1461_v22 = vmax.f32 %v1459_v9, %v1256_v21  ;;  %1530 = vst [vmem:[%s2348_s20 + $0x98] sm:$0xff] %v1165_v20  ;;  %v1269_v18 = vmax.f32 %v1221_v43, 0.0 }
 0x24d   : > { %v1496_v63 = vmax.f32 %v1494_v54, %v1269_v18 }
 0x24e   : > { %v1012_v23 = vpop.f32.mrf.mxu2 }
 0x24f   : > { %v1210_v24 = vadd.f32 %v2398_v55, %v1012_v23 }
 0x250   : > { %v1096_v25 = vpop.f32.mrf.mxu3 }
 0x251   : > { %v1258_v26 = vmax.f32 %v1210_v24, 0.0  ;;  %v1223_v44 = vadd.f32 %v2362_v62, %v1096_v25 }
 0x252   : > { %v1168_v27 = vpop.f32.mrf.mxu1 }
 0x253   : > { %v2440_v29 = vmax.f32 %v1460_v15, %v1258_v26  ;;  %1531 = vst [vmem:[%s2348_s20 + $0xa0] sm:$0xff] %v1168_v27  ;;  %v1271_v51 = vmax.f32 %v1223_v44, 0.0 }
 0x255   : > { %v1497_v0 = vmax.f32 %v1495_v56, %v1271_v51 }
 0x256   : > { %v1015_v30 = vpop.f32.mrf.mxu2 }
 0x257   : > { %v1212_v31 = vadd.f32 %v2398_v55, %v1015_v30 }
 0x258   : > { %v1099_v28 = vpop.f32.mrf.mxu3 }
 0x259   : > { %v1260_v32 = vmax.f32 %v1212_v31, 0.0  ;;  %v1225_v48 = vadd.f32 %v2362_v62, %v1099_v28 }
 0x25a   : > { %v1170_v33 = vpop.f32.mrf.mxu1 }
 0x25b   : > { %v2444_v34 = vmax.f32 %v1461_v22, %v1260_v32  ;;  %1532 = vst [vmem:[%s2348_s20 + $0xa8] sm:$0xff] %v1170_v33  ;;  %v1273_v58 = vmax.f32 %v1225_v48, 0.0 }
 0x25d   : > { %v1498_v59 = vmax.f32 %v1496_v63, %v1273_v58 }
 0x25e   : > { %v1017_v35 = vpop.f32.mrf.mxu2 }
 0x25f   : > { %v1214_v17 = vadd.f32 %v2398_v55, %v1017_v35 }
 0x260   : > { %v1101_v36 = vpop.f32.mrf.mxu3 }
 0x261   : > { %v1227_v45 = vadd.f32 %v2362_v62, %v1101_v36  ;;  %v1262_v22 = vmax.f32 %v1214_v17, 0.0 }
 0x263   : > { %v1275_v60 = vmax.f32 %v1227_v45, 0.0  ;;  %v1464_v31 = vmax.f32 %v2440_v29, %v1262_v22 }
 0x265   : > { %v1499_v49 = vmax.f32 %v1497_v0, %v1275_v60 }
 0x266   : > { %v1020_v38 = vpop.f32.mrf.mxu2 }
 0x267   : > { %v1216_v19 = vadd.f32 %v2398_v55, %v1020_v38 }
 0x268   : > { %v1104_v41 = vpop.f32.mrf.mxu3 }
 0x269   : > { %v1229_v52 = vadd.f32 %v2362_v62, %v1104_v41  ;;  %v1264_v25 = vmax.f32 %v1216_v19, 0.0 }
 0x26b   : > { %v1277_v1 = vmax.f32 %v1229_v52, 0.0  ;;  %v1465_v35 = vmax.f32 %v2444_v34, %v1264_v25 }
 0x26d   : > { %v1500_v4 = vmax.f32 %v1498_v59, %v1277_v1 }
 0x26e   : > { %v1022_v53 = vpop.f32.mrf.mxu2 }
 0x26f   : > { %v1218_v21 = vadd.f32 %v2398_v55, %v1022_v53 }
 0x270   : > { %v1106_v61 = vpop.f32.mrf.mxu3 }
 0x271   : > { %v1231_v2 = vadd.f32 %v2362_v62, %v1106_v61  ;;  %v1266_v26 = vmax.f32 %v1218_v21, 0.0 }
 0x273   : > { %v1279_v3 = vmax.f32 %v1231_v2, 0.0  ;;  %v1466_v36 = vmax.f32 %v1464_v31, %v1266_v26 }
 0x275   : > { %v1501_v5 = vmax.f32 %v1499_v49, %v1279_v3 }
 0x276   : > { %v1025_v6 = vpop.f32.mrf.mxu2 }
 0x277   : > { %v1502_v7 = vmax.f32 %v1500_v4, %v1501_v5  ;;  %v1220_v23 = vadd.f32 %v2398_v55, %v1025_v6 }
 0x278   : > { %v1173_v57 = vpop.f32.mrf.mxu3 }
 0x279   : > { %v1503_v8 = vrot.slane %v1502_v7, 4  ;;  %1533 = vst [vmem:[%s2348_s20 + $0xb0] sm:$0xff] %v1173_v57  ;;  %v1268_v28 = vmax.f32 %v1220_v23, 0.0 }
 0x27b   : > { %v1504_v9 = vmax.f32 %v1502_v7, %v1503_v8  ;;  %v1467_v40 = vmax.f32 %v1465_v35, %v1268_v28 }
 0x27d   : > { %v1505_v10 = vrot.slane %v1504_v9, 2 }
 0x27e   : > { %v1027_v11 = vpop.f32.mrf.mxu2 }
 0x27f   : > { %v1506_v12 = vmax.f32 %v1504_v9, %v1505_v10  ;;  %v1222_v24 = vadd.f32 %v2398_v55, %v1027_v11 }
 0x280   : > { %v1175_v13 = vpop.f32.mrf.mxu3 }
 0x281   : > { %v1507_v14 = vrot.slane %v1506_v12, 1  ;;  %1534 = vst [vmem:[%s2348_s20 + $0xb8] sm:$0xff] %v1175_v13  ;;  %v1270_v32 = vmax.f32 %v1222_v24, 0.0 }
 0x283   : > { %v1508_v62 = vmax.f32 %v1506_v12, %v1507_v14  ;;  %v1468_v41 = vmax.f32 %v1466_v36, %v1270_v32 }
 0x285   : > { %1510 = vst [vmem:[%s2464_s26 + $0x8] sm:$0xff] %v1508_v62 }
 0x286   : > { %v1030_v15 = vpop.f32.mrf.mxu2 }
 0x287   : > { %v1224_v27 = vadd.f32 %v2398_v55, %v1030_v15 }
 0x289   : > { %v1272_v37 = vmax.f32 %v1224_v27, 0.0 }
 0x28b   : > { %v1469_v44 = vmax.f32 %v1467_v40, %v1272_v37 }
 0x28e   : > { %v1032_v16 = vpop.f32.mrf.mxu2 }
 0x28f   : > { %v1226_v30 = vadd.f32 %v2398_v55, %v1032_v16 }
 0x291   : > { %v1274_v38 = vmax.f32 %v1226_v30, 0.0 }
 0x293   : > { %v1470_v46 = vmax.f32 %v1468_v41, %v1274_v38 }
 0x296   : > { %v1035_v20 = vpop.f32.mrf.mxu2 }
 0x297   : > { %v1228_v33 = vadd.f32 %v2398_v55, %v1035_v20 }
 0x299   : > { %v1276_v42 = vmax.f32 %v1228_v33, 0.0 }
 0x29b   : > { %v1471_v29 = vmax.f32 %v1469_v44, %v1276_v42 }
 0x29e   : > { %v1037_v39 = vpop.f32.mrf.mxu2 }
 0x29f   : > { %v1230_v43 = vadd.f32 %v2398_v55, %v1037_v39 }
 0x2a1   : > { %v1278_v47 = vmax.f32 %v1230_v43, 0.0 }
 0x2a3   : > { %v1472_v48 = vmax.f32 %v1470_v46, %v1278_v47 }
 0x2a5   : > { %v1473_v45 = vmax.f32 %v1471_v29, %v1472_v48 }
 0x2a7   : > { %v1474_v50 = vrot.slane %v1473_v45, 4 }
 0x2a9   : > { %v1475_v18 = vmax.f32 %v1473_v45, %v1474_v50 }
 0x2ab   : > { %v1476_v51 = vrot.slane %v1475_v18, 2 }
 0x2ad   : > { %v1477_v34 = vmax.f32 %v1475_v18, %v1476_v51 }
 0x2af   : > { %v1478_v52 = vrot.slane %v1477_v34, 1 }
 0x2b1   : > { %v1479_v53 = vmax.f32 %v1477_v34, %v1478_v52 }
 0x2b3   : > { %1509 = vst [vmem:[%s2464_s26] sm:$0xff] %v1479_v53 }
 0x2b4 PF: > { %s19_s29 = sadd.s32 1, %s2002_s29   ;;  %s2497_s27 = smov %s1998_s28 }
 0x2b5   : > { %p16_p5 = scmp.ge.s32.totalorder %s19_s29, 4   ;;  %s2498_s28 = smov %s2500_s30 }
 0x2b7   :  { %18 = sbr.rel (!%p16_p5) target bundleno = 2 (0x2), region = 93 }

</bundles_post_ra>
